<compile_context>
chip_gen: v7x
topology: tpu7x:2x2x1
jax: 0.10.0
libtpu: 0.0.40
codegen_flags: <defaults>
</compile_context>

<pallas_src>
import jax
import jax.numpy as jnp
from jax import lax
from jax.experimental import pallas as pl
from jax.experimental.pallas import tpu as pltpu


def _round_up(x: int, m: int) -> int:
    return ((x + m - 1) // m) * m


def _make_attn_kernel(num_heads, d_head_pad, s_valid, s_pad, has_mask):
    H, Dhp = num_heads, d_head_pad

    def kernel(*refs):
        if has_mask:
            (x_ref, wqkv_ref, bqkv_ref, wo_ref, bo_ref, mask_ref,
             o_ref, aw_ref, qkv_sc, acc_sc) = refs
        else:
            (x_ref, wqkv_ref, bqkv_ref, wo_ref, bo_ref,
             o_ref, aw_ref, qkv_sc, acc_sc) = refs
            mask_ref = None

        h = pl.program_id(1)

        # ---- once per batch element (first head step) ----------------------
        @pl.when(h == 0)
        def _():
            x = x_ref[0]                                      # (S_pad, E) bf16
            # Fused QKV projection; one lane-aligned (E, 3*Dhp) weight chunk
            # per head, f32 accumulation, single bf16 cast into a scratch that
            # persists across the head grid axis.
            for hh in range(H):                               # static unroll
                chunk = jnp.dot(x, wqkv_ref[hh],
                                preferred_element_type=jnp.float32)
                chunk = chunk + bqkv_ref[hh]                  # (S_pad, 3*Dhp)
                qkv_sc[hh] = chunk.astype(jnp.bfloat16)
            acc_sc[...] = jnp.zeros_like(acc_sc)

        # ---- this head's lane-aligned Q/K/V (bf16, static 128-wide slices) -
        head_qkv = qkv_sc.at[h]                               # (S_pad, 3*Dhp)
        q_h = head_qkv[:, 0:Dhp]
        k_h = head_qkv[:, Dhp:2 * Dhp]
        v_h = head_qkv[:, 2 * Dhp:3 * Dhp]

        # scores = (q*scale) @ k^T (scale pre-folded into Wq/bq), f32 acc.
        s = lax.dot_general(q_h, k_h, (((1,), (1,)), ((), ())),
                            preferred_element_type=jnp.float32)  # (S_pad,S_pad)
        if mask_ref is not None:
            s = s + mask_ref[0, 0]
        if s_pad != s_valid:
            # Mask padded key columns (padding exists only for lane-dense
            # stores); padded query rows are sliced off on the host.
            col = lax.broadcasted_iota(jnp.int32, (s_pad, s_pad), 1)
            s = jnp.where(col < s_valid, s, -1e30)

        # softmax in f32; normalization via EUP reciprocal (VALU relief).
        m = jnp.max(s, axis=-1, keepdims=True)
        p = jnp.exp(s - m)
        denom = jnp.sum(p, axis=-1, keepdims=True)
        probs = p * pl.reciprocal(denom, approx=True)

        aw_ref[0, 0] = probs.astype(aw_ref.dtype)

        # per-head context + its slice of the output projection, accumulated
        # into a persistent f32 scratch (no concat, no relayout).
        ctx_h = jnp.dot(probs.astype(jnp.bfloat16), v_h,
                        preferred_element_type=jnp.float32)      # (S_pad, Dhp)
        acc_sc[...] += jnp.dot(ctx_h.astype(jnp.bfloat16), wo_ref[h],
                               preferred_element_type=jnp.float32)

        # ---- last head: add out-proj bias and emit --------------------------
        @pl.when(h == H - 1)
        def _():
            o_ref[0] = (acc_sc[...] + bo_ref[...]).astype(o_ref.dtype)

    return kernel


def siglip_attention(hidden_states, q_w, q_b, k_w, k_b, v_w, v_b, o_w, o_b,
                     num_heads, attention_mask=None, attn_weights_dtype=None):
    """Fused SiglipAttention forward.

    hidden_states: (B, S, E).  *_w: (E, E) PyTorch Linear weights (out, in).
    *_b: (E,).  attention_mask: optional additive (B, 1, S, S).
    Returns (attn_output (B, S, E), attn_weights (B, H, S, S)).
    """
    B, S, E = hidden_states.shape
    H = int(num_heads)
    if E % H != 0:
        raise ValueError("embed_dim must be divisible by num_heads")
    Dh = E // H
    scale = Dh ** -0.5
    Dhp = _round_up(Dh, 128)             # lane-aligned per-head width
    S_pad = _round_up(S, 128)            # lane-dense aw / o stores

    out_dtype = hidden_states.dtype
    # attn_weights dtype is configurable (bf16 halves the dominant HBM
    # writeback stream); default preserves the module semantics.
    aw_dtype = out_dtype if attn_weights_dtype is None else attn_weights_dtype
    f32 = jnp.float32

    # ---- host-side weight packing (padded lanes are exact zeros) -----------
    def pad_heads(w):                    # (E, E) -> (E, H, Dhp), grouped by head
        w = w.reshape(E, H, Dh)
        return jnp.pad(w, ((0, 0), (0, 0), (0, Dhp - Dh)))

    wq = pad_heads(q_w.T.astype(f32) * scale)        # scale folded into Wq
    wk = pad_heads(k_w.T.astype(f32))
    wv = pad_heads(v_w.T.astype(f32))
    # per-head layout [Q_h | K_h | V_h], each Dhp wide -> (H, E, 3*Dhp)
    wqkv = (jnp.stack([wq, wk, wv], axis=2)          # (E, H, 3, Dhp)
               .transpose(1, 0, 2, 3)
               .reshape(H, E, 3 * Dhp)
               .astype(jnp.bfloat16))

    def pad_bias(b):                     # (E,) -> (H, Dhp)
        return jnp.pad(b.reshape(H, Dh), ((0, 0), (0, Dhp - Dh)))

    bqkv = (jnp.stack([pad_bias(q_b.astype(f32) * scale),
                       pad_bias(k_b.astype(f32)),
                       pad_bias(v_b.astype(f32))], axis=1)   # (H, 3, Dhp)
               .reshape(H, 1, 3 * Dhp)
               .astype(f32))

    # out-proj weight rows laid out per padded head chunk: (H, Dhp, E)
    wo = o_w.T.astype(f32).reshape(H, Dh, E)
    wo = jnp.pad(wo, ((0, 0), (0, Dhp - Dh), (0, 0))).astype(jnp.bfloat16)
    bo = o_b.reshape(1, E).astype(f32)

    x = jnp.pad(hidden_states,
                ((0, 0), (0, S_pad - S), (0, 0))).astype(jnp.bfloat16)

    has_mask = attention_mask is not None
    if has_mask:
        # kept in f32 for numerical safety with large-negative masks
        mask = jnp.pad(attention_mask.astype(f32),
                       ((0, 0), (0, 0), (0, S_pad - S), (0, S_pad - S)))

    resident = pl.Buffered(1)            # fetched once; no double buffer
    in_specs = [
        pl.BlockSpec((1, S_pad, E), lambda b, h: (b, 0, 0)),
        pl.BlockSpec((H, E, 3 * Dhp), lambda b, h: (0, 0, 0),
                     pipeline_mode=resident),
        pl.BlockSpec((H, 1, 3 * Dhp), lambda b, h: (0, 0, 0),
                     pipeline_mode=resident),
        pl.BlockSpec((H, Dhp, E), lambda b, h: (0, 0, 0),
                     pipeline_mode=resident),
        pl.BlockSpec((1, E), lambda b, h: (0, 0), pipeline_mode=resident),
    ]
    inputs = [x, wqkv, bqkv, wo, bo]
    if has_mask:
        in_specs.append(pl.BlockSpec((1, 1, S_pad, S_pad),
                                     lambda b, h: (b, 0, 0, 0)))
        inputs.append(mask)

    # ---- VMEM budget: actual tiles + scratch + transients, with headroom ---
    isz = lambda dt: jnp.dtype(dt).itemsize
    vmem = 0
    vmem += 2 * S_pad * E * 2                      # x (double buffered, bf16)
    vmem += H * E * 3 * Dhp * 2                    # wqkv (resident, single)
    vmem += H * 3 * Dhp * 4                        # bqkv
    vmem += H * Dhp * E * 2                        # wo (resident, single)
    vmem += E * 4                                  # bo
    if has_mask:
        vmem += 2 * S_pad * S_pad * 4              # mask (double buffered)
    vmem += 2 * S_pad * E * isz(out_dtype)         # o tiles
    vmem += 2 * S_pad * S_pad * isz(aw_dtype)      # aw tiles
    vmem += H * S_pad * 3 * Dhp * 2                # qkv scratch (bf16)
    vmem += S_pad * E * 4                          # out-proj accumulator (f32)
    vmem += 4 * S_pad * S_pad * 4                  # score / softmax transients
    vmem_limit = int(min(110 * 2 ** 20, max(32 * 2 ** 20, (vmem * 13) // 10)))

    kernel = _make_attn_kernel(H, Dhp, S, S_pad, has_mask)

    attn_out, attn_weights = pl.pallas_call(
        kernel,
        out_shape=(jax.ShapeDtypeStruct((B, S_pad, E), out_dtype),
                   jax.ShapeDtypeStruct((B, H, S_pad, S_pad), aw_dtype)),
        grid_spec=pltpu.PrefetchScalarGridSpec(
            num_scalar_prefetch=0,
            grid=(B, H),
            in_specs=in_specs,
            out_specs=[pl.BlockSpec((1, S_pad, E), lambda b, h: (b, 0, 0)),
                       pl.BlockSpec((1, 1, S_pad, S_pad),
                                    lambda b, h: (b, h, 0, 0))],
            scratch_shapes=[pltpu.VMEM((H, S_pad, 3 * Dhp), jnp.bfloat16),
                            pltpu.VMEM((S_pad, E), jnp.float32)]),
        compiler_params=pltpu.CompilerParams(
            dimension_semantics=("parallel", "arbitrary"),
            vmem_limit_bytes=vmem_limit),
    )(*inputs)

    # slice the lane/sequence padding back off
    return attn_out[:, :S, :], attn_weights[:, :, :S, :S]


def _reference(hidden, q_w, q_b, k_w, k_b, v_w, v_b, o_w, o_b, H, mask=None):
    """Pure-JAX f32 reference matching the PyTorch module."""
    B, S, E = hidden.shape
    Dh = E // H
    scale = Dh ** -0.5
    q = hidden @ q_w.T + q_b
    k = hidden @ k_w.T + k_b
    v = hidden @ v_w.T + v_b
    q = q.reshape(B, S, H, Dh).transpose(0, 2, 1, 3)
    k = k.reshape(B, S, H, Dh).transpose(0, 2, 1, 3)
    v = v.reshape(B, S, H, Dh).transpose(0, 2, 1, 3)
    s = jnp.einsum('bhqd,bhkd->bhqk', q, k) * scale
    if mask is not None:
        s = s + mask
    p = jax.nn.softmax(s.astype(jnp.float32), axis=-1)
    ctx = jnp.einsum('bhqk,bhkd->bhqd', p, v)
    ctx = ctx.transpose(0, 2, 1, 3).reshape(B, S, E)
    out = ctx @ o_w.T + o_b
    return out, p


if __name__ == "__main__":
    # Small config: hidden_size=32, num_attention_heads=4 (head_dim=8),
    # seq_len=8, batch=2.
    B, S, E, H = 2, 8, 32, 4

    key = jax.random.PRNGKey(0)
    ks = jax.random.split(key, 10)
    hidden = jax.random.normal(ks[0], (B, S, E), dtype=jnp.float32)

    def lin(kw, kb):
        w = jax.random.normal(kw, (E, E), dtype=jnp.float32) * 0.05
        b = jax.random.normal(kb, (E,), dtype=jnp.float32) * 0.05
        return w, b

    q_w, q_b = lin(ks[1], ks[2])
    k_w, k_b = lin(ks[3], ks[4])
    v_w, v_b = lin(ks[5], ks[6])
    o_w, o_b = lin(ks[7], ks[8])
    mask = jax.random.normal(ks[9], (B, 1, S, S), dtype=jnp.float32) * 2.0

    # No-mask path.
    out, aw = siglip_attention(hidden, q_w, q_b, k_w, k_b, v_w, v_b, o_w, o_b, H)
    out = jax.block_until_ready(out)
    aw = jax.block_until_ready(aw)
    ref_out, ref_aw = _reference(hidden, q_w, q_b, k_w, k_b, v_w, v_b, o_w, o_b, H)
    assert out.shape == (B, S, E) and aw.shape == (B, H, S, S)
    # bf16 matmul operands -> loosened tolerance (f32 accumulation / softmax).
    assert jnp.allclose(out, ref_out, atol=2e-2, rtol=2e-2)
    assert jnp.allclose(aw, ref_aw, atol=2e-2, rtol=2e-2)

    # Masked path.
    out_m, aw_m = siglip_attention(hidden, q_w, q_b, k_w, k_b, v_w, v_b, o_w, o_b,
                                   H, attention_mask=mask)
    out_m = jax.block_until_ready(out_m)
    aw_m = jax.block_until_ready(aw_m)
    ref_out_m, ref_aw_m = _reference(hidden, q_w, q_b, k_w, k_b, v_w, v_b,
                                     o_w, o_b, H, mask=mask)
    assert jnp.allclose(out_m, ref_out_m, atol=2e-2, rtol=2e-2)
    assert jnp.allclose(aw_m, ref_aw_m, atol=2e-2, rtol=2e-2)

    print("KERNEL_OK")
</pallas_src>

<mosaic_0001>
module attributes {stable_mosaic.version = 11 : i64} {
  func.func @kernel(%arg0: i32, %arg1: i32, %arg2: memref<1x128x32xbf16, #tpu.memory_space<vmem>>, %arg3: memref<4x32x384xbf16, #tpu.memory_space<vmem>>, %arg4: memref<4x1x384xf32, #tpu.memory_space<vmem>>, %arg5: memref<4x128x32xbf16, #tpu.memory_space<vmem>>, %arg6: memref<1x32xf32, #tpu.memory_space<vmem>>, %arg7: memref<1x128x32xf32, #tpu.memory_space<vmem>>, %arg8: memref<1x1x128x128xf32, #tpu.memory_space<vmem>>, %arg9: memref<4x128x384xbf16, #tpu.memory_space<vmem>>, %arg10: memref<128x32xf32, #tpu.memory_space<vmem>>) attributes {dimension_semantics = [#tpu.dimension_semantics<parallel>, #tpu.dimension_semantics<arbitrary>], iteration_bounds = array<i64: 2, 4>, scalar_prefetch = 0 : i64, scratch_operands = 2 : i64, tpu.core_type = #tpu.core_type<tc>, window_params = [{transform_indices = @transform_0, window_bounds = array<i64: 1, 128, 32>}, {pipeline_mode = #tpu.pipeline_mode<synchronous>, transform_indices = @transform_1, window_bounds = array<i64: 4, 32, 384>}, {pipeline_mode = #tpu.pipeline_mode<synchronous>, transform_indices = @transform_2, window_bounds = array<i64: 4, 1, 384>}, {pipeline_mode = #tpu.pipeline_mode<synchronous>, transform_indices = @transform_3, window_bounds = array<i64: 4, 128, 32>}, {pipeline_mode = #tpu.pipeline_mode<synchronous>, transform_indices = @transform_4, window_bounds = array<i64: 1, 32>}, {transform_indices = @transform_5, window_bounds = array<i64: 1, 128, 32>}, {transform_indices = @transform_6, window_bounds = array<i64: 1, 1, 128, 128>}]} {
    %c0_i32 = arith.constant 0 : i32
    %0 = arith.cmpi eq, %arg1, %c0_i32 : i32
    %1 = arith.extui %0 : i1 to i32
    %c0_i32_0 = arith.constant 0 : i32
    %2 = arith.cmpi ne, %1, %c0_i32_0 : i32
    scf.if %2 {
      %c0_26 = arith.constant 0 : index
      %c0_27 = arith.constant 0 : index
      %c0_28 = arith.constant 0 : index
      %44 = vector.load %arg2[%c0_26, %c0_27, %c0_28] : memref<1x128x32xbf16, #tpu.memory_space<vmem>>, vector<1x128x32xbf16>
      %45 = vector.shape_cast %44 : vector<1x128x32xbf16> to vector<128x32xbf16>
      %c0_29 = arith.constant 0 : index
      %c0_30 = arith.constant 0 : index
      %c0_31 = arith.constant 0 : index
      %46 = vector.load %arg3[%c0_29, %c0_30, %c0_31] : memref<4x32x384xbf16, #tpu.memory_space<vmem>>, vector<1x32x384xbf16>
      %47 = vector.shape_cast %46 : vector<1x32x384xbf16> to vector<32x384xbf16>
      %cst_32 = arith.constant dense<0.000000e+00> : vector<128x384xf32>
      %48 = tpu.matmul %45, %47, %cst_32 {dimension_numbers = #tpu.dot_dimension_numbers<[1], [0], [0], [1], [0, 0, 1, 1], [], []>} : vector<128x32xbf16>, vector<32x384xbf16>, vector<128x384xf32> -> vector<128x384xf32>
      %c0_33 = arith.constant 0 : index
      %c0_34 = arith.constant 0 : index
      %c0_35 = arith.constant 0 : index
      %49 = vector.load %arg4[%c0_33, %c0_34, %c0_35] : memref<4x1x384xf32, #tpu.memory_space<vmem>>, vector<1x1x384xf32>
      %50 = vector.shape_cast %49 : vector<1x1x384xf32> to vector<1x384xf32>
      %51 = vector.broadcast %50 : vector<1x384xf32> to vector<128x384xf32>
      %52 = arith.addf %48, %51 : vector<128x384xf32>
      %53 = arith.truncf %52 : vector<128x384xf32> to vector<128x384xbf16>
      %c0_36 = arith.constant 0 : index
      %c0_37 = arith.constant 0 : index
      %c0_38 = arith.constant 0 : index
      %54 = vector.load %arg9[%c0_36, %c0_37, %c0_38] : memref<4x128x384xbf16, #tpu.memory_space<vmem>>, vector<1x128x384xbf16>
      %55 = vector.shape_cast %54 : vector<1x128x384xbf16> to vector<128x384xbf16>
      %56 = vector.shape_cast %53 : vector<128x384xbf16> to vector<1x128x384xbf16>
      tpu.vector_store %arg9[%c0_36, %c0_37, %c0_38], %56 {strides = array<i32>} : memref<4x128x384xbf16, #tpu.memory_space<vmem>>, vector<1x128x384xbf16>,
      %c1 = arith.constant 1 : index
      %c0_39 = arith.constant 0 : index
      %c0_40 = arith.constant 0 : index
      %57 = vector.load %arg3[%c1, %c0_39, %c0_40] : memref<4x32x384xbf16, #tpu.memory_space<vmem>>, vector<1x32x384xbf16>
      %58 = vector.shape_cast %57 : vector<1x32x384xbf16> to vector<32x384xbf16>
      %cst_41 = arith.constant dense<0.000000e+00> : vector<128x384xf32>
      %59 = tpu.matmul %45, %58, %cst_41 {dimension_numbers = #tpu.dot_dimension_numbers<[1], [0], [0], [1], [0, 0, 1, 1], [], []>} : vector<128x32xbf16>, vector<32x384xbf16>, vector<128x384xf32> -> vector<128x384xf32>
      %c1_42 = arith.constant 1 : index
      %c0_43 = arith.constant 0 : index
      %c0_44 = arith.constant 0 : index
      %60 = vector.load %arg4[%c1_42, %c0_43, %c0_44] : memref<4x1x384xf32, #tpu.memory_space<vmem>>, vector<1x1x384xf32>
      %61 = vector.shape_cast %60 : vector<1x1x384xf32> to vector<1x384xf32>
      %62 = vector.broadcast %61 : vector<1x384xf32> to vector<128x384xf32>
      %63 = arith.addf %59, %62 : vector<128x384xf32>
      %64 = arith.truncf %63 : vector<128x384xf32> to vector<128x384xbf16>
      %c1_45 = arith.constant 1 : index
      %c0_46 = arith.constant 0 : index
      %c0_47 = arith.constant 0 : index
      %65 = vector.load %arg9[%c1_45, %c0_46, %c0_47] : memref<4x128x384xbf16, #tpu.memory_space<vmem>>, vector<1x128x384xbf16>
      %66 = vector.shape_cast %65 : vector<1x128x384xbf16> to vector<128x384xbf16>
      %67 = vector.shape_cast %64 : vector<128x384xbf16> to vector<1x128x384xbf16>
      tpu.vector_store %arg9[%c1_45, %c0_46, %c0_47], %67 {strides = array<i32>} : memref<4x128x384xbf16, #tpu.memory_space<vmem>>, vector<1x128x384xbf16>,
      %c2 = arith.constant 2 : index
      %c0_48 = arith.constant 0 : index
      %c0_49 = arith.constant 0 : index
      %68 = vector.load %arg3[%c2, %c0_48, %c0_49] : memref<4x32x384xbf16, #tpu.memory_space<vmem>>, vector<1x32x384xbf16>
      %69 = vector.shape_cast %68 : vector<1x32x384xbf16> to vector<32x384xbf16>
      %cst_50 = arith.constant dense<0.000000e+00> : vector<128x384xf32>
      %70 = tpu.matmul %45, %69, %cst_50 {dimension_numbers = #tpu.dot_dimension_numbers<[1], [0], [0], [1], [0, 0, 1, 1], [], []>} : vector<128x32xbf16>, vector<32x384xbf16>, vector<128x384xf32> -> vector<128x384xf32>
      %c2_51 = arith.constant 2 : index
      %c0_52 = arith.constant 0 : index
      %c0_53 = arith.constant 0 : index
      %71 = vector.load %arg4[%c2_51, %c0_52, %c0_53] : memref<4x1x384xf32, #tpu.memory_space<vmem>>, vector<1x1x384xf32>
      %72 = vector.shape_cast %71 : vector<1x1x384xf32> to vector<1x384xf32>
      %73 = vector.broadcast %72 : vector<1x384xf32> to vector<128x384xf32>
      %74 = arith.addf %70, %73 : vector<128x384xf32>
      %75 = arith.truncf %74 : vector<128x384xf32> to vector<128x384xbf16>
      %c2_54 = arith.constant 2 : index
      %c0_55 = arith.constant 0 : index
      %c0_56 = arith.constant 0 : index
      %76 = vector.load %arg9[%c2_54, %c0_55, %c0_56] : memref<4x128x384xbf16, #tpu.memory_space<vmem>>, vector<1x128x384xbf16>
      %77 = vector.shape_cast %76 : vector<1x128x384xbf16> to vector<128x384xbf16>
      %78 = vector.shape_cast %75 : vector<128x384xbf16> to vector<1x128x384xbf16>
      tpu.vector_store %arg9[%c2_54, %c0_55, %c0_56], %78 {strides = array<i32>} : memref<4x128x384xbf16, #tpu.memory_space<vmem>>, vector<1x128x384xbf16>,
      %c3 = arith.constant 3 : index
      %c0_57 = arith.constant 0 : index
      %c0_58 = arith.constant 0 : index
      %79 = vector.load %arg3[%c3, %c0_57, %c0_58] : memref<4x32x384xbf16, #tpu.memory_space<vmem>>, vector<1x32x384xbf16>
      %80 = vector.shape_cast %79 : vector<1x32x384xbf16> to vector<32x384xbf16>
      %cst_59 = arith.constant dense<0.000000e+00> : vector<128x384xf32>
      %81 = tpu.matmul %45, %80, %cst_59 {dimension_numbers = #tpu.dot_dimension_numbers<[1], [0], [0], [1], [0, 0, 1, 1], [], []>} : vector<128x32xbf16>, vector<32x384xbf16>, vector<128x384xf32> -> vector<128x384xf32>
      %c3_60 = arith.constant 3 : index
      %c0_61 = arith.constant 0 : index
      %c0_62 = arith.constant 0 : index
      %82 = vector.load %arg4[%c3_60, %c0_61, %c0_62] : memref<4x1x384xf32, #tpu.memory_space<vmem>>, vector<1x1x384xf32>
      %83 = vector.shape_cast %82 : vector<1x1x384xf32> to vector<1x384xf32>
      %84 = vector.broadcast %83 : vector<1x384xf32> to vector<128x384xf32>
      %85 = arith.addf %81, %84 : vector<128x384xf32>
      %86 = arith.truncf %85 : vector<128x384xf32> to vector<128x384xbf16>
      %c3_63 = arith.constant 3 : index
      %c0_64 = arith.constant 0 : index
      %c0_65 = arith.constant 0 : index
      %87 = vector.load %arg9[%c3_63, %c0_64, %c0_65] : memref<4x128x384xbf16, #tpu.memory_space<vmem>>, vector<1x128x384xbf16>
      %88 = vector.shape_cast %87 : vector<1x128x384xbf16> to vector<128x384xbf16>
      %89 = vector.shape_cast %86 : vector<128x384xbf16> to vector<1x128x384xbf16>
      tpu.vector_store %arg9[%c3_63, %c0_64, %c0_65], %89 {strides = array<i32>} : memref<4x128x384xbf16, #tpu.memory_space<vmem>>, vector<1x128x384xbf16>,
      %cst_66 = arith.constant 0.000000e+00 : f32
      %90 = vector.broadcast %cst_66 : f32 to vector<128x32xf32>
      %c0_67 = arith.constant 0 : index
      %c0_68 = arith.constant 0 : index
      %91 = vector.load %arg10[%c0_67, %c0_68] : memref<128x32xf32, #tpu.memory_space<vmem>>, vector<128x32xf32>
      tpu.vector_store %arg10[%c0_67, %c0_68], %90 {strides = array<i32>} : memref<128x32xf32, #tpu.memory_space<vmem>>, vector<128x32xf32>,
    } else {
    }
    %c0_i32_1 = arith.constant 0 : i32
    %c0_i32_2 = arith.constant 0 : i32
    %3 = tpu.memref_slice %arg9[%arg1, %c0_i32_1, %c0_i32_2] : memref<4x128x384xbf16, #tpu.memory_space<vmem>> -> memref<1x128x384xbf16, #tpu.memory_space<vmem>>
    %4 = tpu.memref_squeeze %3 : memref<1x128x384xbf16, #tpu.memory_space<vmem>> -> memref<128x384xbf16, #tpu.memory_space<vmem>>
    %c0 = arith.constant 0 : index
    %c0_3 = arith.constant 0 : index
    %5 = vector.load %4[%c0, %c0_3] : memref<128x384xbf16, #tpu.memory_space<vmem>>, vector<128x128xbf16>
    %c0_i32_4 = arith.constant 0 : i32
    %c0_i32_5 = arith.constant 0 : i32
    %6 = tpu.memref_slice %arg9[%arg1, %c0_i32_4, %c0_i32_5] : memref<4x128x384xbf16, #tpu.memory_space<vmem>> -> memref<1x128x384xbf16, #tpu.memory_space<vmem>>
    %7 = tpu.memref_squeeze %6 : memref<1x128x384xbf16, #tpu.memory_space<vmem>> -> memref<128x384xbf16, #tpu.memory_space<vmem>>
    %c0_6 = arith.constant 0 : index
    %c128 = arith.constant 128 : index
    %8 = vector.load %7[%c0_6, %c128] : memref<128x384xbf16, #tpu.memory_space<vmem>>, vector<128x128xbf16>
    %c0_i32_7 = arith.constant 0 : i32
    %c0_i32_8 = arith.constant 0 : i32
    %9 = tpu.memref_slice %arg9[%arg1, %c0_i32_7, %c0_i32_8] : memref<4x128x384xbf16, #tpu.memory_space<vmem>> -> memref<1x128x384xbf16, #tpu.memory_space<vmem>>
    %10 = tpu.memref_squeeze %9 : memref<1x128x384xbf16, #tpu.memory_space<vmem>> -> memref<128x384xbf16, #tpu.memory_space<vmem>>
    %c0_9 = arith.constant 0 : index
    %c256 = arith.constant 256 : index
    %11 = vector.load %10[%c0_9, %c256] : memref<128x384xbf16, #tpu.memory_space<vmem>>, vector<128x128xbf16>
    %cst = arith.constant dense<0.000000e+00> : vector<128x128xf32>
    %12 = tpu.matmul %5, %8, %cst {dimension_numbers = #tpu.dot_dimension_numbers<[1], [1], [0], [0], [0, 0, 1, 0], [], []>} : vector<128x128xbf16>, vector<128x128xbf16>, vector<128x128xf32> -> vector<128x128xf32>
    %13 = tpu.iota {dimensions = array<i32: 1>} : vector<128x128xi32>
    %c8_i32 = arith.constant 8 : i32
    %14 = vector.broadcast %c8_i32 : i32 to vector<128x128xi32>
    %15 = arith.cmpi slt, %13, %14 : vector<128x128xi32>
    %cst_10 = arith.constant -1.000000e+30 : f32
    %16 = vector.broadcast %cst_10 : f32 to vector<128x128xf32>
    %17 = arith.select %15, %12, %16 : vector<128x128xi1>, vector<128x128xf32>
    %cst_11 = arith.constant dense<0xFF800000> : vector<128xf32>
    %18 = vector.multi_reduction <maximumf>, %17, %cst_11 [1] : vector<128x128xf32> to vector<128xf32>
    %19 = vector.shape_cast %18 : vector<128xf32> to vector<128x1xf32>
    %20 = vector.broadcast %19 : vector<128x1xf32> to vector<128x128xf32>
    %21 = arith.subf %17, %20 : vector<128x128xf32>
    %22 = math.exp %21 : vector<128x128xf32>
    %cst_12 = arith.constant dense<0.000000e+00> : vector<128xf32>
    %23 = vector.multi_reduction <add>, %22, %cst_12 [1] : vector<128x128xf32> to vector<128xf32>
    %24 = vector.shape_cast %23 : vector<128xf32> to vector<128x1xf32>
    %25 = tpu.reciprocal %24 {approx = true} : vector<128x1xf32> -> vector<128x1xf32>
    %26 = vector.broadcast %25 : vector<128x1xf32> to vector<128x128xf32>
    %27 = arith.mulf %22, %26 : vector<128x128xf32>
    %c0_13 = arith.constant 0 : index
    %c0_14 = arith.constant 0 : index
    %c0_15 = arith.constant 0 : index
    %c0_16 = arith.constant 0 : index
    %28 = vector.load %arg8[%c0_13, %c0_14, %c0_15, %c0_16] : memref<1x1x128x128xf32, #tpu.memory_space<vmem>>, vector<1x1x128x128xf32>
    %29 = vector.shape_cast %28 : vector<1x1x128x128xf32> to vector<128x128xf32>
    %30 = vector.shape_cast %27 : vector<128x128xf32> to vector<1x1x128x128xf32>
    tpu.vector_store %arg8[%c0_13, %c0_14, %c0_15, %c0_16], %30 {strides = array<i32>} : memref<1x1x128x128xf32, #tpu.memory_space<vmem>>, vector<1x1x128x128xf32>,
    %31 = arith.truncf %27 : vector<128x128xf32> to vector<128x128xbf16>
    %cst_17 = arith.constant dense<0.000000e+00> : vector<128x128xf32>
    %32 = tpu.matmul %31, %11, %cst_17 {dimension_numbers = #tpu.dot_dimension_numbers<[1], [0], [0], [1], [0, 0, 1, 1], [], []>} : vector<128x128xbf16>, vector<128x128xbf16>, vector<128x128xf32> -> vector<128x128xf32>
    %c0_18 = arith.constant 0 : index
    %c0_19 = arith.constant 0 : index
    %33 = vector.load %arg10[%c0_18, %c0_19] : memref<128x32xf32, #tpu.memory_space<vmem>>, vector<128x32xf32>
    %34 = arith.truncf %32 : vector<128x128xf32> to vector<128x128xbf16>
    %35 = arith.index_cast %arg1 : i32 to index
    %c0_20 = arith.constant 0 : index
    %c0_21 = arith.constant 0 : index
    %36 = vector.load %arg5[%35, %c0_20, %c0_21] : memref<4x128x32xbf16, #tpu.memory_space<vmem>>, vector<1x128x32xbf16>
    %37 = vector.shape_cast %36 : vector<1x128x32xbf16> to vector<128x32xbf16>
    %cst_22 = arith.constant dense<0.000000e+00> : vector<128x32xf32>
    %38 = tpu.matmul %34, %37, %cst_22 {dimension_numbers = #tpu.dot_dimension_numbers<[1], [0], [0], [1], [0, 0, 1, 1], [], []>} : vector<128x128xbf16>, vector<128x32xbf16>, vector<128x32xf32> -> vector<128x32xf32>
    %39 = arith.addf %33, %38 : vector<128x32xf32>
    %c0_23 = arith.constant 0 : index
    %c0_24 = arith.constant 0 : index
    %40 = vector.load %arg10[%c0_23, %c0_24] : memref<128x32xf32, #tpu.memory_space<vmem>>, vector<128x32xf32>
    tpu.vector_store %arg10[%c0_23, %c0_24], %39 {strides = array<i32>} : memref<128x32xf32, #tpu.memory_space<vmem>>, vector<128x32xf32>,
    %c3_i32 = arith.constant 3 : i32
    %41 = arith.cmpi eq, %arg1, %c3_i32 : i32
    %42 = arith.extui %41 : i1 to i32
    %c0_i32_25 = arith.constant 0 : i32
    %43 = arith.cmpi ne, %42, %c0_i32_25 : i32
    scf.if %43 {
      %c0_26 = arith.constant 0 : index
      %c0_27 = arith.constant 0 : index
      %44 = vector.load %arg10[%c0_26, %c0_27] : memref<128x32xf32, #tpu.memory_space<vmem>>, vector<128x32xf32>
      %c0_28 = arith.constant 0 : index
      %c0_29 = arith.constant 0 : index
      %45 = vector.load %arg6[%c0_28, %c0_29] : memref<1x32xf32, #tpu.memory_space<vmem>>, vector<1x32xf32>
      %46 = vector.broadcast %45 : vector<1x32xf32> to vector<128x32xf32>
      %47 = arith.addf %44, %46 : vector<128x32xf32>
      %c0_30 = arith.constant 0 : index
      %c0_31 = arith.constant 0 : index
      %c0_32 = arith.constant 0 : index
      %48 = vector.load %arg7[%c0_30, %c0_31, %c0_32] : memref<1x128x32xf32, #tpu.memory_space<vmem>>, vector<1x128x32xf32>
      %49 = vector.shape_cast %48 : vector<1x128x32xf32> to vector<128x32xf32>
      %50 = vector.shape_cast %47 : vector<128x32xf32> to vector<1x128x32xf32>
      tpu.vector_store %arg7[%c0_30, %c0_31, %c0_32], %50 {strides = array<i32>} : memref<1x128x32xf32, #tpu.memory_space<vmem>>, vector<1x128x32xf32>,
    } else {
    }
    return
  }
  func.func @transform_0(%arg0: i32, %arg1: i32) -> (i32, i32, i32) {
    %c0_i32 = arith.constant 0 : i32
    %c0_i32_0 = arith.constant 0 : i32
    %c0_i32_1 = arith.constant 0 : i32
    return %arg0, %c0_i32, %c0_i32_0 : i32, i32, i32
  }
  func.func @transform_1(%arg0: i32, %arg1: i32) -> (i32, i32, i32) {
    %c0_i32 = arith.constant 0 : i32
    %c0_i32_0 = arith.constant 0 : i32
    %c0_i32_1 = arith.constant 0 : i32
    %c0_i32_2 = arith.constant 0 : i32
    return %c0_i32, %c0_i32_0, %c0_i32_1 : i32, i32, i32
  }
  func.func @transform_2(%arg0: i32, %arg1: i32) -> (i32, i32, i32) {
    %c0_i32 = arith.constant 0 : i32
    %c0_i32_0 = arith.constant 0 : i32
    %c0_i32_1 = arith.constant 0 : i32
    %c0_i32_2 = arith.constant 0 : i32
    return %c0_i32, %c0_i32_0, %c0_i32_1 : i32, i32, i32
  }
  func.func @transform_3(%arg0: i32, %arg1: i32) -> (i32, i32, i32) {
    %c0_i32 = arith.constant 0 : i32
    %c0_i32_0 = arith.constant 0 : i32
    %c0_i32_1 = arith.constant 0 : i32
    %c0_i32_2 = arith.constant 0 : i32
    return %c0_i32, %c0_i32_0, %c0_i32_1 : i32, i32, i32
  }
  func.func @transform_4(%arg0: i32, %arg1: i32) -> (i32, i32) {
    %c0_i32 = arith.constant 0 : i32
    %c0_i32_0 = arith.constant 0 : i32
    %c0_i32_1 = arith.constant 0 : i32
    return %c0_i32, %c0_i32_0 : i32, i32
  }
  func.func @transform_5(%arg0: i32, %arg1: i32) -> (i32, i32, i32) {
    %c0_i32 = arith.constant 0 : i32
    %c0_i32_0 = arith.constant 0 : i32
    %c0_i32_1 = arith.constant 0 : i32
    return %arg0, %c0_i32, %c0_i32_0 : i32, i32, i32
  }
  func.func @transform_6(%arg0: i32, %arg1: i32) -> (i32, i32, i32, i32) {
    %c0_i32 = arith.constant 0 : i32
    %c0_i32_0 = arith.constant 0 : i32
    %c0_i32_1 = arith.constant 0 : i32
    return %arg0, %arg1, %c0_i32, %c0_i32_0 : i32, i32, i32, i32
  }
}

</mosaic_0001>

<bundles_post_ra>
// kernel: tpu_custom_call.1
= control target key start
LH: loop header
LB: loop body
LE: loop exit
PB: predicated region body
PF: predicated region fallthrough
CT: control target
= control target key end

     0   :  { %12 = vsyncpa [#allocation5], 0  ;;  %s4119_s0 = inlined_call_operand.vmem [shape: bf16[2,128,32], index: 0, kind: input, shape index: {}]   ;;  %s4120_s1 = inlined_call_operand.vmem [shape: bf16[4,32,384], index: 1, kind: input, shape index: {}]   ;;  %s4121_s2 = inlined_call_operand.vmem [shape: f32[4,1,384], index: 2, kind: input, shape index: {}]   ;;  %s4122_s3 = inlined_call_operand.vmem [shape: bf16[4,128,32], index: 3, kind: input, shape index: {}]   ;;  %s4123_s4 = inlined_call_operand.vmem [shape: f32[1,32], index: 4, kind: input, shape index: {}]   ;;  %s4124_s5 = inlined_call_operand.vmem [shape: f32[2,128,32], index: 5, kind: output, shape index: {0}]   ;;  %s4125_s6 = inlined_call_operand.hbm [shape: f32[2,4,128,128], index: 6, kind: output, shape index: {1}]  }
   0x1   :  { %14 = vsyncpa [#allocation5 + $0x1], 0  ;;  %s3209_s21 = smov 0   ;;  %s3211_s22 = smov 0  }
   0x2   :  { %s3213_s23 = smov 0   ;;  %s3215_s24 = smov 0  }
   0x3   :  { %s3217_s25 = smov 0   ;;  %s3219_s26 = smov 0  }
   0x4   :  { %s3221_s27 = smov 0   ;;  %s3223_s28 = smov 0  }
   0x5 LB: > { %4130 = sst [smem:[#allocation7_spill]] %s3163_s27  ;;  %s2465_s29 = sadd.s32 4294967295, %s3167_s28   ;;  %s3167_s28 = sphi %s3223_s28, %s20_s28   ;;  %s3163_s27 = sphi %s3221_s27, %s4138_s27   ;;  %s3159_s26 = sphi %s3219_s26, %s4143_s26   ;;  %s3155_s25 = sphi %s3217_s25, %s4136_s25   ;;  %s3151_s24 = sphi %s3215_s24, %s4142_s24   ;;  %s3147_s23 = sphi %s3213_s23, %s4141_s23   ;;  %s3143_s22 = sphi %s3211_s22, %s4140_s22   ;;  %s3139_s21 = sphi %s3209_s21, %s4139_s21  }
   0x6   : > { %s2466_s30 = sadd.s32 4294967294, %s3167_s28   ;;  %s29_s7 = sadd.s32 1, %s3159_s26 }
   0x7   : > { %p30_p0 = scmp.ge.s32.totalorder %s29_s7, 4  ;;  %s32_s8 = sadd.s32 1, %s3163_s27 }
   0x8   : > { %p187_p1 = scmp.ne.s32.totalorder %s3147_s23, %s3143_s22  ;;  %p188_p2 = scmp.eq.s32.totalorder %s2465_s29, 7 }
   0x9   : > { %s4145_s7 = smov (%p30_p0, %s29_s7), 0  ;;  %s4147_s8 = smov (!%p30_p0, %s32_s8), %s3163_s27 }
   0xa   : > { %4131 = sst [smem:[#allocation8_spill]] %s4145_s7  ;;  %s173_s9 = ssub.s32 %s3159_s26, %s4145_s7 }
   0xb   : > { %p3260_p3 = por %p188_p2, %p187_p1  ;;  %p34_p4 = scmp.ge.s32.totalorder %s4147_s8, 2 }
   0xc   : > { %p193_p5 = scmp.ne.s32.totalorder %s3143_s22, %s3139_s21  ;;  %p194_p6 = scmp.eq.s32.totalorder %s2466_s30, 7 }
   0xd   : > { %p2469_p7 = scmp.ge.s32.totalorder %s3167_s28, 1  ;;  %s4149_s8 = smov (%p34_p4, %s4147_s8), 0 }
   0xe   : > { %4133 = sst [smem:[#allocation9_spill]] %s4149_s8  ;;  %p3269_p8 = por %p194_p6, %p193_p5 }
   0xf   : > { %p232_p9 = scmp.lt.s32.totalorder %s3167_s28, 9  ;;  %s172_s12 = ssub.s32 %s3163_s27, %s4149_s8 }
  0x10   : > { %s177_s13 = sadd.s32 1, %s3147_s23  ;;  %s174_s14 = sor.u32 %s173_s9, %s172_s12 }
  0x11   : > { %p233_p10 = pnand %p2469_p7, %p232_p9  ;;  %p175_p11 = scmp.eq.s32.totalorder %s174_s14, 0 }
  0x12   : > { %s4128_s16 = sand.u32 (!%p233_p10), 1, %s3143_s22   ;;  %p267_p12 = scmp.lt.s32.totalorder (!%p233_p10), %s3155_s25, 1 }
  0x13   : > { %s3278_s15 = scalar_select %p175_p11, %s3147_s23, %s177_s13  }
  0x14   : > { %236 = sbr.rel (%p233_p10) target bundleno = 1547 (0x60b), region = 40  ;;  %s2470_s17 = sshll.u32 (!%p233_p10), %s4128_s16, 7 }
  0x15   : > { %s3295_s8 = scalar_lea.vmem (!%p233_p10), [#allocation4], %s2470_s17  ;;  %p2475_p13 = scmp.ne.s32.totalorder (!%p233_p10), %s3151_s24, 0 }
  0x1b   : > { %s268_s18 = scalar_select %p267_p12, %s3155_s25, 1 }
  0x1c   : > { %281 = sbr.rel (%p2475_p13) target bundleno = 442 (0x1ba), region = 44  ;;  %v2961_v0 = vld [vmem:[%s4120_s1 + $0x4] ss:$12 sps:$4 sm:$0xff] (!%p2475_p13)   ;;  %v2963_v1 = vld [vmem:[%s4120_s1 + $0x8] ss:$12 sps:$4 sm:$0xff] (!%p2475_p13)   ;;  %v3169_v2 = vmov (!%p2475_p13), 0   ;;  %v308_v33 = vlaneseq (!%p2475_p13) }
  0x1d   : > { %s2618_s19 = sshll.u32 %s268_s18, 6  ;;  %s2619_s20 = sshll.u32 %s268_s18, 7  ;;  %452 = vmatprep.mubr.bf16.mxu0 (!%p2475_p13), %v3169_v2  ;;  %420 = vmatprep.subr.bf16.mxu0 (!%p2475_p13), %v2961_v0  ;;  %v2964_v3 = vld [vmem:[%s4120_s1] ss:$12 sps:$4 sm:$0xff] (!%p2475_p13)   ;;  %vm395_vm0 = vcmask (!%p2475_p13), 261120  }
  0x1e   : > { %s3288_s9 = scalar_lea.vmem %s4119_s0, %s2618_s19  ;;  %s3293_s14 = scalar_lea.vmem %s4124_s5, %s2619_s20  ;;  %2710 = vmatprep.subr.bf16.mxu1 (!%p2475_p13), %v2963_v1  ;;  %v2965_v4 = vld [vmem:[%s4120_s1 + $0x1c] ss:$12 sps:$4 sm:$0xff] (!%p2475_p13)   ;;  %421 = vmatpush1.bf16.msra.mxu0 (!%p2475_p13), %v2964_v3  ;;  %v2967_v5 = vld [vmem:[%s4120_s1 + $0x20] ss:$12 sps:$4 sm:$0xff] (!%p2475_p13)   ;;  %v2968_v6 = vld [vmem:[%s4120_s1 + $0x18] ss:$12 sps:$4 sm:$0xff] (!%p2475_p13)  }
  0x1f   : > { %2711 = vmatpush3.bf16.msra.mxu1 (!%p2475_p13), %v2963_v1  ;;  %422 = vmatprep.subr.bf16.mxu0 (!%p2475_p13), %v2965_v4  ;;  %v3318_v7 = vld [vmem:[%s3288_s9] sm:$0xff] (!%p2475_p13)   ;;  %v3321_v8 = vld [vmem:[%s3288_s9 + $0x8] sm:$0xff] (!%p2475_p13)   ;;  %v2971_v9 = vld [vmem:[%s4120_s1 + $0x30] ss:$12 sps:$4 sm:$0xff] (!%p2475_p13)   ;;  %v309_v34 = vshrl.u32 (!%p2475_p13), %v308_v33, 7 }
  0x20   : > { %2712 = vmatprep.subr.bf16.mxu1 (!%p2475_p13), %v2967_v5  ;;  %2714 = vmatprep.mubr.msk.bf16.mxu1 (!%p2475_p13), %vm395_vm0, %v3318_v7  ;;  %v2973_v10 = vld [vmem:[%s4120_s1 + $0x34] ss:$12 sps:$4 sm:$0xff] (!%p2475_p13)   ;;  %v2974_v11 = vld [vmem:[%s4120_s1 + $0x38] ss:$12 sps:$4 sm:$0xff] (!%p2475_p13)   ;;  %v2984_v17 = vld [vmem:[%s4120_s1 + $0x50] ss:$12 sps:$4 sm:$0xff] (!%p2475_p13)  }
  0x21   : > { %v3335_v12 = vld [vmem:[%s3288_s9 + $0x10] sm:$0xff] (!%p2475_p13)   ;;  %v2981_v14 = vld [vmem:[%s4120_s1 + $0x4c] ss:$12 sps:$4 sm:$0xff] (!%p2475_p13)   ;;  %v3354_v16 = vld [vmem:[%s3288_s9 + $0x20] sm:$0xff] (!%p2475_p13)   ;;  %v3554_v35 = vsub.s32 (!%p2475_p13), 0, %v309_v34  ;;  %v3556_v36 = vsub.s32 (!%p2475_p13), 2, %v309_v34 }
  0x22   : > { %423 = vmatpush1.bf16.msra.mxu0 (!%p2475_p13), %v2968_v6  ;;  %v2979_v13 = vld [vmem:[%s4120_s1 + $0x48] ss:$12 sps:$4 sm:$0xff] (!%p2475_p13)   ;;  %v3351_v15 = vld [vmem:[%s3288_s9 + $0x18] sm:$0xff] (!%p2475_p13)   ;;  %v2988_v19 = vld [vmem:[%s4120_s1 + $0x64] ss:$12 sps:$4 sm:$0xff] (!%p2475_p13)   ;;  %v3561_v38 = vsub.s32 (!%p2475_p13), 1, %v309_v34 }
  0x23   : > { %2713 = vmatpush3.bf16.msra.mxu1 %v2967_v5  ;;  %2730 = vmatprep.subr.bf16.mxu0 %v2974_v11  ;;  %v2985_v18 = vld [vmem:[%s4120_s1 + $0x68] ss:$12 sps:$4 sm:$0xff]   ;;  %v3386_v22 = vld [vmem:[%s3288_s9 + $0x38] sm:$0xff]   ;;  %v2989_v23 = vld [vmem:[%s4120_s1 + $0x80] ss:$12 sps:$4 sm:$0xff]  }
  0x24   : > { %737 = vmatprep.subr.bf16.mxu1 %v2973_v10  ;;  %v3373_v20 = vld [vmem:[%s3288_s9 + $0x28] sm:$0xff]   ;;  %v3376_v21 = vld [vmem:[%s3288_s9 + $0x30] sm:$0xff]   ;;  %v2990_v27 = vld [vmem:[%s4120_s1 + $0x78] ss:$12 sps:$4 sm:$0xff]  }
  0x25   : > { %2490 = vmatmul.mubr.msk.bf16.vlgmr.msra.gmra.mrb[0].mxu0 %vm395_vm0, %v3318_v7  ;;  %v2995_v24 = vld [vmem:[%s4120_s1 + $0x94] ss:$12 sps:$4 sm:$0xff]   ;;  %v2992_v26 = vld [vmem:[%s4120_s1 + $0x7c] ss:$12 sps:$4 sm:$0xff]   ;;  %v2996_v28 = vld [vmem:[%s4120_s1 + $0x98] ss:$12 sps:$4 sm:$0xff]  }
  0x26   : > { %2715 = vmatmul.mubr.msk.bf16.vlgmr.msra.gmra.mrb[0].mxu1 %vm395_vm0, %v3321_v8  ;;  %2731 = vmatpush3.bf16.msra.mxu0 %v2974_v11  ;;  %v2986_v25 = vld [vmem:[%s4120_s1 + $0x60] ss:$12 sps:$4 sm:$0xff]   ;;  %v2993_v29 = vld [vmem:[%s4120_s1 + $0x90] ss:$12 sps:$4 sm:$0xff]   ;;  %v2997_v32 = vld [vmem:[%s4120_s1 + $0xa8] ss:$12 sps:$4 sm:$0xff]  }
  0x27   : > { %738 = vmatpush1.bf16.msra.mxu1 %v2971_v9  ;;  %462 = vmatprep.mubr.bf16.mxu0 %v3169_v2  ;;  %v2999_v30 = vld [vmem:[%s4120_s1 + $0xac] ss:$12 sps:$4 sm:$0xff]   ;;  %v3000_v31 = vld [vmem:[%s4120_s1 + $0xb0] ss:$12 sps:$4 sm:$0xff]   ;;  %v306_v37 = vld [vmem:[%s4121_s2] sm:$0x7] }
  0x28   : > { %2718 = vmatprep.mubr.msk.bf16.mxu1 %vm395_vm0, %v3335_v12  ;;  %739 = vmatprep.subr.bf16.mxu1 %v2981_v14  ;;  %v3564_v39 = vrot.slane %v306_v37, %v3554_v35  ;;  %v3567_v40 = vrot.slane %v306_v37, %v3556_v36  ;;  %v3570_v43 = vrot.slane %v306_v37, %v3561_v38 }
  0x29   : > { %2732 = vmatprep.subr.bf16.mxu0 %v2984_v17 }
  0x2a   : > { %2733 = vmatpush3.bf16.msra.mxu0 %v2984_v17 }
  0x2b   : > { %740 = vmatpush1.bf16.msra.mxu1 %v2979_v13  ;;  %1055 = vmatprep.subr.bf16.mxu0 %v2988_v19 }
  0x2c   : > { %2750 = vmatprep.subr.bf16.mxu1 %v2985_v18 }
  0x2d   : > { %2491 = vmatmul.mubr.msk.bf16.gmra.mrb[4].mxu0 %vm395_vm0, %v3321_v8 }
  0x2e   : > { %2719 = vmatmul.mubr.msk.bf16.gmra.mrb[4].mxu1 %vm395_vm0, %v3351_v15  ;;  %472 = vmatprep.mubr.bf16.mxu0 %v3169_v2 }
  0x2f   : > { %2722 = vmatprep.mubr.msk.bf16.mxu1 %vm395_vm0, %v3354_v16 }
  0x35   : > { %2492 = vmatmul.mubr.msk.bf16.gmra.mrb[8].mxu0 %vm395_vm0, %v3335_v12 }
  0x36   : > { %2723 = vmatmul.mubr.msk.bf16.gmra.mrb[8].mxu1 %vm395_vm0, %v3373_v20  ;;  %482 = vmatprep.mubr.bf16.mxu0 %v3169_v2 }
  0x37   : > { %2726 = vmatprep.mubr.msk.bf16.mxu1 %vm395_vm0, %v3376_v21 }
  0x3d   : > { %2493 = vmatmul.mubr.msk.bf16.gmra.mrb[12].mxu0 %vm395_vm0, %v3351_v15 }
  0x3e   : > { %2727 = vmatmul.mubr.msk.bf16.gmra.mrb[12].mxu1 %vm395_vm0, %v3386_v22  ;;  %492 = vmatprep.mubr.bf16.mxu0 %v3169_v2 }
  0x3f   : > { %769 = vmatprep.mubr.bf16.mxu1 %v3169_v2 }
  0x45   : > { %2494 = vmatmul.mubr.msk.bf16.gmra.mrb[16].mxu0 %vm395_vm0, %v3354_v16 }
  0x46   : > { %2521 = vmatmul.mubr.msk.bf16.vlgmr.msra.gmra.mrb[16].mxu1 %vm395_vm0, %v3318_v7  ;;  %502 = vmatprep.mubr.bf16.mxu0 %v3169_v2 }
  0x47   : > { %2751 = vmatpush3.bf16.msra.mxu1 %v2985_v18  ;;  %779 = vmatprep.mubr.bf16.mxu1 %v3169_v2 }
  0x48   : > { %2752 = vmatprep.subr.bf16.mxu1 %v2989_v23 }
  0x4b   : > { %2753 = vmatpush3.bf16.msra.mxu1 %v2989_v23 }
  0x4c   : > { %1373 = vmatprep.subr.bf16.mxu1 %v2995_v24 }
  0x4d   : > { %2495 = vmatmul.mubr.msk.bf16.gmra.mrb[20].mxu0 %vm395_vm0, %v3373_v20 }
  0x4e   : > { %2522 = vmatmul.mubr.msk.bf16.gmra.mrb[20].mxu1 %vm395_vm0, %v3321_v8  ;;  %512 = vmatprep.mubr.bf16.mxu0 %v3169_v2 }
  0x4f   : > { %789 = vmatprep.mubr.bf16.mxu1 %v3169_v2 }
  0x55   : > { %2496 = vmatmul.mubr.msk.bf16.gmra.mrb[24].mxu0 %vm395_vm0, %v3376_v21 }
  0x56   : > { %2523 = vmatmul.mubr.msk.bf16.gmra.mrb[24].mxu1 %vm395_vm0, %v3335_v12  ;;  %522 = vmatprep.mubr.bf16.mxu0 %v3169_v2 }
  0x57   : > { %799 = vmatprep.mubr.bf16.mxu1 %v3169_v2 }
  0x5d   : > { %2497 = vmatmul.mubr.msk.bf16.gmra.mrb[28].mxu0 %vm395_vm0, %v3386_v22 }
  0x5e   : > { %2524 = vmatmul.mubr.msk.bf16.gmra.mrb[28].mxu1 %vm395_vm0, %v3351_v15  ;;  %2734 = vmatprep.mubr.msk.bf16.mxu0 %vm395_vm0, %v3318_v7 }
  0x5f   : > { %809 = vmatprep.mubr.bf16.mxu1 %v3169_v2 }
  0x65   : > { %2735 = vmatmul.mubr.msk.bf16.vlgmr.msra.gmra.mrb[32].mxu0 %vm395_vm0, %v3321_v8 }
  0x66   : > { %2525 = vmatmul.mubr.msk.bf16.gmra.mrb[32].mxu1 %vm395_vm0, %v3354_v16  ;;  %1056 = vmatpush1.bf16.msra.mxu0 %v2986_v25 }
  0x67   : > { %819 = vmatprep.mubr.bf16.mxu1 %v3169_v2  ;;  %2738 = vmatprep.mubr.msk.bf16.mxu0 %vm395_vm0, %v3335_v12 }
  0x68   : > { %1057 = vmatprep.subr.bf16.mxu0 %v2992_v26 }
  0x6a   : > { %1058 = vmatpush1.bf16.msra.mxu0 %v2990_v27 }
  0x6b   : > { %2770 = vmatprep.subr.bf16.mxu0 %v2996_v28 }
  0x6d   : > { %2739 = vmatmul.mubr.msk.bf16.gmra.mrb[36].mxu0 %vm395_vm0, %v3351_v15 }
  0x6e   : > { %2526 = vmatmul.mubr.msk.bf16.gmra.mrb[36].mxu1 %vm395_vm0, %v3373_v20  ;;  %2742 = vmatprep.mubr.msk.bf16.mxu0 %vm395_vm0, %v3354_v16 }
  0x6f   : > { %829 = vmatprep.mubr.bf16.mxu1 %v3169_v2 }
  0x75   : > { %2743 = vmatmul.mubr.msk.bf16.gmra.mrb[40].mxu0 %vm395_vm0, %v3373_v20 }
  0x76   : > { %2527 = vmatmul.mubr.msk.bf16.gmra.mrb[40].mxu1 %vm395_vm0, %v3376_v21  ;;  %2746 = vmatprep.mubr.msk.bf16.mxu0 %vm395_vm0, %v3376_v21 }
  0x77   : > { %839 = vmatprep.mubr.bf16.mxu1 %v3169_v2 }
  0x7d   : > { %2747 = vmatmul.mubr.msk.bf16.gmra.mrb[44].mxu0 %vm395_vm0, %v3386_v22 }
  0x7e   : > { %2528 = vmatmul.mubr.msk.bf16.gmra.mrb[44].mxu1 %vm395_vm0, %v3386_v22  ;;  %1087 = vmatprep.mubr.bf16.mxu0 %v3169_v2 }
  0x7f   : > { %2754 = vmatprep.mubr.msk.bf16.mxu1 %vm395_vm0, %v3318_v7 }
  0x85   : > { %2552 = vmatmul.mubr.msk.bf16.vlgmr.msra.gmra.mrb[48].mxu0 %vm395_vm0, %v3318_v7 }
  0x86   : > { %2755 = vmatmul.mubr.msk.bf16.vlgmr.msra.gmra.mrb[48].mxu1 %vm395_vm0, %v3321_v8  ;;  %2771 = vmatpush3.bf16.msra.mxu0 %v2996_v28 }
  0x87   : > { %1374 = vmatpush1.bf16.msra.mxu1 %v2993_v29  ;;  %1097 = vmatprep.mubr.bf16.mxu0 %v3169_v2 }
  0x88   : > { %2758 = vmatprep.mubr.msk.bf16.mxu1 %vm395_vm0, %v3335_v12  ;;  %1375 = vmatprep.subr.bf16.mxu1 %v2999_v30 }
  0x89   : > { %2772 = vmatprep.subr.bf16.mxu0 %v3000_v31 }
  0x8a   : > { %2773 = vmatpush3.bf16.msra.mxu0 %v3000_v31 }
  0x8b   : > { %1376 = vmatpush1.bf16.msra.mxu1 %v2997_v32 }
  0x8d   : > { %2553 = vmatmul.mubr.msk.bf16.gmra.mrb[52].mxu0 %vm395_vm0, %v3321_v8 }
  0x8e   : > { %2759 = vmatmul.mubr.msk.bf16.gmra.mrb[52].mxu1 %vm395_vm0, %v3351_v15  ;;  %1107 = vmatprep.mubr.bf16.mxu0 %v3169_v2 }
  0x8f   : > { %2762 = vmatprep.mubr.msk.bf16.mxu1 %vm395_vm0, %v3354_v16 }
  0x95   : > { %2554 = vmatmul.mubr.msk.bf16.gmra.mrb[56].mxu0 %vm395_vm0, %v3335_v12 }
  0x96   : > { %2763 = vmatmul.mubr.msk.bf16.gmra.mrb[56].mxu1 %vm395_vm0, %v3373_v20  ;;  %1117 = vmatprep.mubr.bf16.mxu0 %v3169_v2 }
  0x97   : > { %2766 = vmatprep.mubr.msk.bf16.mxu1 %vm395_vm0, %v3376_v21 }
  0x9d   : > { %2555 = vmatmul.mubr.msk.bf16.gmra.mrb[60].mxu0 %vm395_vm0, %v3351_v15 }
  0x9e   : > { %2767 = vmatmul.mubr.msk.bf16.gmra.mrb[60].mxu1 %vm395_vm0, %v3386_v22  ;;  %1127 = vmatprep.mubr.bf16.mxu0 %v3169_v2 }
  0x9f   : > { %1405 = vmatprep.mubr.bf16.mxu1 %v3169_v2 }
  0xa5   : > { %2556 = vmatmul.mubr.msk.bf16.gmra.mrb[64].mxu0 %vm395_vm0, %v3354_v16 }
  0xa6   : > { %2583 = vmatmul.mubr.msk.bf16.vlgmr.msra.gmra.mrb[64].mxu1 %vm395_vm0, %v3318_v7  ;;  %1137 = vmatprep.mubr.bf16.mxu0 %v3169_v2 }
  0xa7   : > { %1415 = vmatprep.mubr.bf16.mxu1 %v3169_v2 }
  0xad   : > { %2557 = vmatmul.mubr.msk.bf16.gmra.mrb[68].mxu0 %vm395_vm0, %v3373_v20 }
  0xae   : > { %2584 = vmatmul.mubr.msk.bf16.gmra.mrb[68].mxu1 %vm395_vm0, %v3321_v8  ;;  %1147 = vmatprep.mubr.bf16.mxu0 %v3169_v2 }
  0xaf   : > { %1425 = vmatprep.mubr.bf16.mxu1 %v3169_v2 }
  0xb5   : > { %2558 = vmatmul.mubr.msk.bf16.gmra.mrb[72].mxu0 %vm395_vm0, %v3376_v21 }
  0xb6   : > { %2585 = vmatmul.mubr.msk.bf16.gmra.mrb[72].mxu1 %vm395_vm0, %v3335_v12  ;;  %1157 = vmatprep.mubr.bf16.mxu0 %v3169_v2 }
  0xb7   : > { %1435 = vmatprep.mubr.bf16.mxu1 %v3169_v2 }
  0xbd   : > { %2559 = vmatmul.mubr.msk.bf16.gmra.mrb[76].mxu0 %vm395_vm0, %v3386_v22 }
  0xbe   : > { %2586 = vmatmul.mubr.msk.bf16.gmra.mrb[76].mxu1 %vm395_vm0, %v3351_v15  ;;  %2774 = vmatprep.mubr.msk.bf16.mxu0 %vm395_vm0, %v3318_v7 }
  0xbf   : > { %1445 = vmatprep.mubr.bf16.mxu1 %v3169_v2 }
  0xc5   : > { %2775 = vmatmul.mubr.msk.bf16.vlgmr.msra.gmra.mrb[80].mxu0 %vm395_vm0, %v3321_v8 }
  0xc6   : > { %2587 = vmatmul.mubr.msk.bf16.gmra.mrb[80].mxu1 %vm395_vm0, %v3354_v16  ;;  %2778 = vmatprep.mubr.msk.bf16.mxu0 %vm395_vm0, %v3335_v12 }
  0xc7   : > { %1455 = vmatprep.mubr.bf16.mxu1 %v3169_v2 }
  0xcd   : > { %2779 = vmatmul.mubr.msk.bf16.gmra.mrb[84].mxu0 %vm395_vm0, %v3351_v15 }
  0xce   : > { %2588 = vmatmul.mubr.msk.bf16.gmra.mrb[84].mxu1 %vm395_vm0, %v3373_v20  ;;  %2782 = vmatprep.mubr.msk.bf16.mxu0 %vm395_vm0, %v3354_v16 }
  0xcf   : > { %1465 = vmatprep.mubr.bf16.mxu1 %v3169_v2 }
  0xd5   : > { %2783 = vmatmul.mubr.msk.bf16.gmra.mrb[88].mxu0 %vm395_vm0, %v3373_v20 }
  0xd6   : > { %2589 = vmatmul.mubr.msk.bf16.gmra.mrb[88].mxu1 %vm395_vm0, %v3376_v21  ;;  %2786 = vmatprep.mubr.msk.bf16.mxu0 %vm395_vm0, %v3376_v21 }
  0xd7   : > { %1475 = vmatprep.mubr.bf16.mxu1 %v3169_v2 }
  0xdd   : > { %2787 = vmatmul.mubr.msk.bf16.gmra.mrb[92].mxu0 %vm395_vm0, %v3386_v22 }
  0xde   : > { %2590 = vmatmul.mubr.msk.bf16.gmra.mrb[92].mxu1 %vm395_vm0, %v3386_v22 }
  0xf8   : > { %v454_v41 = vpop.f32.mrb[0].mxu0 }
  0xf9   : > { %v2716_v42 = vpop.f32.mrb[0].mxu1  ;;  %v456_v44 = vpop.f32.mrb[1].mxu0  ;;  %v455_v48 = vadd.f32 %v454_v41, %v3564_v39 }
  0xfa   : > { %v567_v45 = vpop.f32.mrb[1].mxu1  ;;  %v458_v46 = vpop.f32.mrb[2].mxu0  ;;  %v576_v49 = vadd.f32 %v2716_v42, %v3567_v40  ;;  %v457_v54 = vadd.f32 %v456_v44, %v3570_v43 }
  0xfb   : > { %v2717_v47 = vpop.f32.mrb[2].mxu1  ;;  %v459_v50 = vadd.f32 %v458_v46, %v3564_v39  ;;  %v460_v52 = vpop.f32.mrb[3].mxu0  ;;  %v568_v55 = vadd.f32 %v567_v45, %v3567_v40 }
  0xfc   : > { %v579_v51 = vadd.f32 %v2717_v47, %v3567_v40  ;;  %v570_v53 = vpop.f32.mrb[3].mxu1  ;;  %v461_v56 = vadd.f32 %v460_v52, %v3570_v43 }
  0xfd   : > { %v571_v57 = vadd.f32 %v570_v53, %v3567_v40  ;;  %v630_v58 = vpack.c.bf16 %v459_v50, %v455_v48 }
  0xfe   : > { %v635_v59 = vpack.c.bf16 %v579_v51, %v576_v49  ;;  %v631_v60 = vpack.c.bf16 %v461_v56, %v457_v54 }
  0xff   : > { %v632_v61 = vpack.c.bf16 %v571_v57, %v568_v55  ;;  %654 = vst [vmem:[#allocation2] sm:$0xff] %v630_v58 }
 0x100   : > { %659 = vst [vmem:[#allocation2 + $0x28] sm:$0xff] %v635_v59  ;;  %655 = vst [vmem:[#allocation2 + $0x8] sm:$0xff] %v631_v60  ;;  %v464_v62 = vpop.f32.mrb[4].mxu0  ;;  %v3607_v60 = vld [vmem:[%s4121_s2 + $0x3] sm:$0x7] }
 0x101   : > { %656 = vst [vmem:[#allocation2 + $0x10] sm:$0xff] %v632_v61  ;;  %v2720_v63 = vpop.f32.mrb[4].mxu1  ;;  %v466_v0 = vpop.f32.mrb[5].mxu0  ;;  %v465_v4 = vadd.f32 %v464_v62, %v3564_v39 }
 0x102   : > { %v583_v1 = vpop.f32.mrb[5].mxu1  ;;  %v468_v2 = vpop.f32.mrb[6].mxu0  ;;  %v592_v5 = vadd.f32 %v2720_v63, %v3567_v40  ;;  %v467_v10 = vadd.f32 %v466_v0, %v3570_v43 }
 0x103   : > { %v2721_v3 = vpop.f32.mrb[6].mxu1  ;;  %v469_v6 = vadd.f32 %v468_v2, %v3564_v39  ;;  %v470_v8 = vpop.f32.mrb[7].mxu0  ;;  %v584_v11 = vadd.f32 %v583_v1, %v3567_v40  ;;  %v3611_v1 = vrot.slane %v3607_v60, %v3554_v35 }
 0x104   : > { %v595_v7 = vadd.f32 %v2721_v3, %v3567_v40  ;;  %v586_v9 = vpop.f32.mrb[7].mxu1  ;;  %v471_v12 = vadd.f32 %v470_v8, %v3570_v43 }
 0x105   : > { %v587_v13 = vadd.f32 %v586_v9, %v3567_v40  ;;  %v633_v14 = vpack.c.bf16 %v469_v6, %v465_v4 }
 0x106   : > { %v641_v15 = vpack.c.bf16 %v595_v7, %v592_v5  ;;  %v634_v16 = vpack.c.bf16 %v471_v12, %v467_v10 }
 0x107   : > { %v638_v17 = vpack.c.bf16 %v587_v13, %v584_v11  ;;  %657 = vst [vmem:[#allocation2 + $0x18] sm:$0xff] %v633_v14 }
 0x108   : > { %665 = vst [vmem:[#allocation2 + $0x58] sm:$0xff] %v641_v15  ;;  %658 = vst [vmem:[#allocation2 + $0x20] sm:$0xff] %v634_v16  ;;  %v474_v18 = vpop.f32.mrb[8].mxu0 }
 0x109   : > { %662 = vst [vmem:[#allocation2 + $0x40] sm:$0xff] %v638_v17  ;;  %v2724_v19 = vpop.f32.mrb[8].mxu1  ;;  %v476_v20 = vpop.f32.mrb[9].mxu0  ;;  %v475_v24 = vadd.f32 %v474_v18, %v3564_v39 }
 0x10a   : > { %v599_v21 = vpop.f32.mrb[9].mxu1  ;;  %v478_v22 = vpop.f32.mrb[10].mxu0  ;;  %v608_v25 = vadd.f32 %v2724_v19, %v3567_v40  ;;  %v477_v30 = vadd.f32 %v476_v20, %v3570_v43 }
 0x10b   : > { %v2725_v23 = vpop.f32.mrb[10].mxu1  ;;  %v479_v26 = vadd.f32 %v478_v22, %v3564_v39  ;;  %v480_v28 = vpop.f32.mrb[11].mxu0  ;;  %v600_v31 = vadd.f32 %v599_v21, %v3567_v40 }
 0x10c   : > { %v611_v27 = vadd.f32 %v2725_v23, %v3567_v40  ;;  %v602_v29 = vpop.f32.mrb[11].mxu1  ;;  %v481_v32 = vadd.f32 %v480_v28, %v3570_v43 }
 0x10d   : > { %v603_v33 = vadd.f32 %v602_v29, %v3567_v40  ;;  %v636_v34 = vpack.c.bf16 %v479_v26, %v475_v24 }
 0x10e   : > { %v647_v37 = vpack.c.bf16 %v611_v27, %v608_v25  ;;  %v637_v41 = vpack.c.bf16 %v481_v32, %v477_v30 }
 0x10f   : > { %v644_v42 = vpack.c.bf16 %v603_v33, %v600_v31  ;;  %660 = vst [vmem:[#allocation2 + $0x30] sm:$0xff] %v636_v34 }
 0x110   : > { %671 = vst [vmem:[#allocation2 + $0x88] sm:$0xff] %v647_v37  ;;  %661 = vst [vmem:[#allocation2 + $0x38] sm:$0xff] %v637_v41  ;;  %v484_v44 = vpop.f32.mrb[12].mxu0 }
 0x111   : > { %668 = vst [vmem:[#allocation2 + $0x70] sm:$0xff] %v644_v42  ;;  %v2728_v45 = vpop.f32.mrb[12].mxu1  ;;  %v486_v46 = vpop.f32.mrb[13].mxu0  ;;  %v485_v50 = vadd.f32 %v484_v44, %v3564_v39 }
 0x112   : > { %v615_v47 = vpop.f32.mrb[13].mxu1  ;;  %v488_v48 = vpop.f32.mrb[14].mxu0  ;;  %v624_v51 = vadd.f32 %v2728_v45, %v3567_v40  ;;  %v487_v56 = vadd.f32 %v486_v46, %v3570_v43 }
 0x113   : > { %v2729_v49 = vpop.f32.mrb[14].mxu1  ;;  %v489_v52 = vadd.f32 %v488_v48, %v3564_v39  ;;  %v490_v54 = vpop.f32.mrb[15].mxu0  ;;  %v616_v57 = vadd.f32 %v615_v47, %v3567_v40 }
 0x114   : > { %v627_v53 = vadd.f32 %v2729_v49, %v3567_v40  ;;  %v618_v55 = vpop.f32.mrb[15].mxu1  ;;  %v491_v58 = vadd.f32 %v490_v54, %v3570_v43 }
 0x115   : > { %v619_v59 = vadd.f32 %v618_v55, %v3567_v40  ;;  %v639_v61 = vpack.c.bf16 %v489_v52, %v485_v50  ;;  %v3615_v40 = vrot.slane %v3607_v60, %v3561_v38 }
 0x116   : > { %v653_v62 = vpack.c.bf16 %v627_v53, %v624_v51  ;;  %v640_v63 = vpack.c.bf16 %v491_v58, %v487_v56 }
 0x117   : > { %v650_v0 = vpack.c.bf16 %v619_v59, %v616_v57  ;;  %663 = vst [vmem:[#allocation2 + $0x48] sm:$0xff] %v639_v61 }
 0x118   : > { %677 = vst [vmem:[#allocation2 + $0xb8] sm:$0xff] %v653_v62  ;;  %664 = vst [vmem:[#allocation2 + $0x50] sm:$0xff] %v640_v63  ;;  %v494_v2 = vpop.f32.mrb[16].mxu0 }
 0x119   : > { %674 = vst [vmem:[#allocation2 + $0xa0] sm:$0xff] %v650_v0  ;;  %v771_v3 = vpop.f32.mrb[16].mxu1  ;;  %v496_v4 = vpop.f32.mrb[17].mxu0  ;;  %v495_v8 = vadd.f32 %v494_v2, %v3564_v39 }
 0x11a   : > { %v773_v5 = vpop.f32.mrb[17].mxu1  ;;  %v498_v6 = vpop.f32.mrb[18].mxu0  ;;  %v772_v9 = vadd.f32 %v771_v3, %v3611_v1  ;;  %v497_v14 = vadd.f32 %v496_v4, %v3570_v43 }
 0x11b   : > { %v775_v7 = vpop.f32.mrb[18].mxu1  ;;  %v499_v10 = vadd.f32 %v498_v6, %v3564_v39  ;;  %v500_v12 = vpop.f32.mrb[19].mxu0  ;;  %v774_v15 = vadd.f32 %v773_v5, %v3615_v40 }
 0x11c   : > { %v776_v11 = vadd.f32 %v775_v7, %v3611_v1  ;;  %v777_v13 = vpop.f32.mrb[19].mxu1  ;;  %v501_v16 = vadd.f32 %v500_v12, %v3570_v43 }
 0x11d   : > { %v778_v17 = vadd.f32 %v777_v13, %v3615_v40  ;;  %v642_v18 = vpack.c.bf16 %v499_v10, %v495_v8 }
 0x11e   : > { %v947_v19 = vpack.c.bf16 %v776_v11, %v772_v9  ;;  %v643_v20 = vpack.c.bf16 %v501_v16, %v497_v14 }
 0x11f   : > { %v948_v21 = vpack.c.bf16 %v778_v17, %v774_v15  ;;  %666 = vst [vmem:[#allocation2 + $0x60] sm:$0xff] %v642_v18 }
 0x120   : > { %972 = vst [vmem:[#allocation2 + $0xc0] sm:$0xff] %v947_v19  ;;  %667 = vst [vmem:[#allocation2 + $0x68] sm:$0xff] %v643_v20  ;;  %v504_v22 = vpop.f32.mrb[20].mxu0 }
 0x121   : > { %973 = vst [vmem:[#allocation2 + $0xc8] sm:$0xff] %v948_v21  ;;  %v781_v23 = vpop.f32.mrb[20].mxu1  ;;  %v506_v24 = vpop.f32.mrb[21].mxu0  ;;  %v505_v28 = vadd.f32 %v504_v22, %v3564_v39 }
 0x122   : > { %v783_v25 = vpop.f32.mrb[21].mxu1  ;;  %v508_v26 = vpop.f32.mrb[22].mxu0  ;;  %v782_v29 = vadd.f32 %v781_v23, %v3611_v1  ;;  %v507_v34 = vadd.f32 %v506_v24, %v3570_v43 }
 0x123   : > { %v785_v27 = vpop.f32.mrb[22].mxu1  ;;  %v509_v30 = vadd.f32 %v508_v26, %v3564_v39  ;;  %v510_v32 = vpop.f32.mrb[23].mxu0  ;;  %v784_v37 = vadd.f32 %v783_v25, %v3615_v40 }
 0x124   : > { %v786_v31 = vadd.f32 %v785_v27, %v3611_v1  ;;  %v787_v33 = vpop.f32.mrb[23].mxu1  ;;  %v511_v41 = vadd.f32 %v510_v32, %v3570_v43 }
 0x125   : > { %v788_v42 = vadd.f32 %v787_v33, %v3615_v40  ;;  %v645_v44 = vpack.c.bf16 %v509_v30, %v505_v28  ;;  %v3170_v28 = vmov 0.0  }
 0x126   : > { %v950_v45 = vpack.c.bf16 %v786_v31, %v782_v29  ;;  %v646_v46 = vpack.c.bf16 %v511_v41, %v507_v34  ;;  %1632 = vst.msk [vmem:[#allocation3] sm:$0xff] %vm395_vm0, %v3170_v28  ;;  %1633 = vst.msk [vmem:[#allocation3 + $0x8] sm:$0xff] %vm395_vm0, %v3170_v28 }
 0x127   : > { %v951_v47 = vpack.c.bf16 %v788_v42, %v784_v37  ;;  %669 = vst [vmem:[#allocation2 + $0x78] sm:$0xff] %v645_v44  ;;  %1634 = vst.msk [vmem:[#allocation3 + $0x10] sm:$0xff] %vm395_vm0, %v3170_v28 }
 0x128   : > { %975 = vst [vmem:[#allocation2 + $0xd8] sm:$0xff] %v950_v45  ;;  %670 = vst [vmem:[#allocation2 + $0x80] sm:$0xff] %v646_v46  ;;  %v514_v48 = vpop.f32.mrb[24].mxu0 }
 0x129   : > { %976 = vst [vmem:[#allocation2 + $0xe0] sm:$0xff] %v951_v47  ;;  %v791_v49 = vpop.f32.mrb[24].mxu1  ;;  %v516_v50 = vpop.f32.mrb[25].mxu0  ;;  %v515_v54 = vadd.f32 %v514_v48, %v3564_v39  ;;  %1635 = vst.msk [vmem:[#allocation3 + $0x18] sm:$0xff] %vm395_vm0, %v3170_v28 }
 0x12a   : > { %v793_v51 = vpop.f32.mrb[25].mxu1  ;;  %v518_v52 = vpop.f32.mrb[26].mxu0  ;;  %v792_v55 = vadd.f32 %v791_v49, %v3611_v1  ;;  %v517_v61 = vadd.f32 %v516_v50, %v3570_v43  ;;  %1636 = vst.msk [vmem:[#allocation3 + $0x20] sm:$0xff] %vm395_vm0, %v3170_v28  ;;  %1637 = vst.msk [vmem:[#allocation3 + $0x28] sm:$0xff] %vm395_vm0, %v3170_v28 }
 0x12b   : > { %v795_v53 = vpop.f32.mrb[26].mxu1  ;;  %v519_v56 = vadd.f32 %v518_v52, %v3564_v39  ;;  %v520_v58 = vpop.f32.mrb[27].mxu0  ;;  %v794_v62 = vadd.f32 %v793_v51, %v3615_v40  ;;  %1638 = vst.msk [vmem:[#allocation3 + $0x30] sm:$0xff] %vm395_vm0, %v3170_v28  ;;  %1639 = vst.msk [vmem:[#allocation3 + $0x38] sm:$0xff] %vm395_vm0, %v3170_v28 }
 0x12c   : > { %v796_v57 = vadd.f32 %v795_v53, %v3611_v1  ;;  %v797_v59 = vpop.f32.mrb[27].mxu1  ;;  %v521_v63 = vadd.f32 %v520_v58, %v3570_v43  ;;  %1640 = vst.msk [vmem:[#allocation3 + $0x40] sm:$0xff] %vm395_vm0, %v3170_v28  ;;  %1641 = vst.msk [vmem:[#allocation3 + $0x48] sm:$0xff] %vm395_vm0, %v3170_v28 }
 0x12d   : > { %v798_v0 = vadd.f32 %v797_v59, %v3615_v40  ;;  %v648_v2 = vpack.c.bf16 %v519_v56, %v515_v54  ;;  %1642 = vst.msk [vmem:[#allocation3 + $0x50] sm:$0xff] %vm395_vm0, %v3170_v28  ;;  %1643 = vst.msk [vmem:[#allocation3 + $0x58] sm:$0xff] %vm395_vm0, %v3170_v28 }
 0x12e   : > { %v953_v3 = vpack.c.bf16 %v796_v57, %v792_v55  ;;  %v649_v4 = vpack.c.bf16 %v521_v63, %v517_v61  ;;  %1644 = vst.msk [vmem:[#allocation3 + $0x60] sm:$0xff] %vm395_vm0, %v3170_v28  ;;  %1645 = vst.msk [vmem:[#allocation3 + $0x68] sm:$0xff] %vm395_vm0, %v3170_v28 }
 0x12f   : > { %v954_v5 = vpack.c.bf16 %v798_v0, %v794_v62  ;;  %672 = vst [vmem:[#allocation2 + $0x90] sm:$0xff] %v648_v2  ;;  %1646 = vst.msk [vmem:[#allocation3 + $0x70] sm:$0xff] %vm395_vm0, %v3170_v28 }
 0x130   : > { %978 = vst [vmem:[#allocation2 + $0xf0] sm:$0xff] %v953_v3  ;;  %673 = vst [vmem:[#allocation2 + $0x98] sm:$0xff] %v649_v4  ;;  %v524_v6 = vpop.f32.mrb[28].mxu0 }
 0x131   : > { %979 = vst [vmem:[#allocation2 + $0xf8] sm:$0xff] %v954_v5  ;;  %v801_v7 = vpop.f32.mrb[28].mxu1  ;;  %v526_v8 = vpop.f32.mrb[29].mxu0  ;;  %v525_v12 = vadd.f32 %v524_v6, %v3564_v39  ;;  %1647 = vst.msk [vmem:[#allocation3 + $0x78] sm:$0xff] %vm395_vm0, %v3170_v28 }
 0x132   : > { %v803_v9 = vpop.f32.mrb[29].mxu1  ;;  %v528_v10 = vpop.f32.mrb[30].mxu0  ;;  %v802_v13 = vadd.f32 %v801_v7, %v3611_v1  ;;  %v527_v18 = vadd.f32 %v526_v8, %v3570_v43 }
 0x133   : > { %v805_v11 = vpop.f32.mrb[30].mxu1  ;;  %v529_v14 = vadd.f32 %v528_v10, %v3564_v39  ;;  %v530_v16 = vpop.f32.mrb[31].mxu0  ;;  %v804_v19 = vadd.f32 %v803_v9, %v3615_v40  ;;  %v3651_v39 = vrot.slane %v3607_v60, %v3556_v36 }
 0x134   : > { %v806_v15 = vadd.f32 %v805_v11, %v3611_v1  ;;  %v807_v17 = vpop.f32.mrb[31].mxu1  ;;  %v531_v20 = vadd.f32 %v530_v16, %v3570_v43 }
 0x135   : > { %v808_v21 = vadd.f32 %v807_v17, %v3615_v40  ;;  %v651_v22 = vpack.c.bf16 %v529_v14, %v525_v12 }
 0x136   : > { %v956_v23 = vpack.c.bf16 %v806_v15, %v802_v13  ;;  %v652_v24 = vpack.c.bf16 %v531_v20, %v527_v18 }
 0x137   : > { %v957_v25 = vpack.c.bf16 %v808_v21, %v804_v19  ;;  %675 = vst [vmem:[#allocation2 + $0xa8] sm:$0xff] %v651_v22 }
 0x138   : > { %981 = vst [vmem:[#allocation2 + $0x108] sm:$0xff] %v956_v23  ;;  %676 = vst [vmem:[#allocation2 + $0xb0] sm:$0xff] %v652_v24  ;;  %v2736_v27 = vpop.f32.mrb[32].mxu0 }
 0x139   : > { %982 = vst [vmem:[#allocation2 + $0x110] sm:$0xff] %v957_v25  ;;  %v811_v26 = vpop.f32.mrb[32].mxu1  ;;  %v884_v60 = vpop.f32.mrb[33].mxu0  ;;  %v893_v32 = vadd.f32 %v2736_v27, %v3651_v39 }
 0x13a   : > { %v813_v43 = vpop.f32.mrb[33].mxu1  ;;  %v2737_v30 = vpop.f32.mrb[34].mxu0  ;;  %v812_v31 = vadd.f32 %v811_v26, %v3611_v1  ;;  %v885_v44 = vadd.f32 %v884_v60, %v3651_v39 }
 0x13b   : > { %v815_v29 = vpop.f32.mrb[34].mxu1  ;;  %v896_v34 = vadd.f32 %v2737_v30, %v3651_v39  ;;  %v887_v41 = vpop.f32.mrb[35].mxu0  ;;  %v814_v42 = vadd.f32 %v813_v43, %v3615_v40 }
 0x13c   : > { %v816_v33 = vadd.f32 %v815_v29, %v3611_v1  ;;  %v817_v37 = vpop.f32.mrb[35].mxu1  ;;  %v888_v46 = vadd.f32 %v887_v41, %v3651_v39 }
 0x13d   : > { %v818_v45 = vadd.f32 %v817_v37, %v3615_v40  ;;  %v952_v48 = vpack.c.bf16 %v896_v34, %v893_v32 }
 0x13e   : > { %v959_v47 = vpack.c.bf16 %v816_v33, %v812_v31  ;;  %v949_v50 = vpack.c.bf16 %v888_v46, %v885_v44 }
 0x13f   : > { %v960_v49 = vpack.c.bf16 %v818_v45, %v814_v42  ;;  %977 = vst [vmem:[#allocation2 + $0xe8] sm:$0xff] %v952_v48 }
 0x140   : > { %984 = vst [vmem:[#allocation2 + $0x120] sm:$0xff] %v959_v47  ;;  %974 = vst [vmem:[#allocation2 + $0xd0] sm:$0xff] %v949_v50  ;;  %v2740_v52 = vpop.f32.mrb[36].mxu0 }
 0x141   : > { %985 = vst [vmem:[#allocation2 + $0x128] sm:$0xff] %v960_v49  ;;  %v821_v51 = vpop.f32.mrb[36].mxu1  ;;  %v900_v54 = vpop.f32.mrb[37].mxu0  ;;  %v909_v58 = vadd.f32 %v2740_v52, %v3651_v39  ;;  %v2545_v49 = vld [vmem:[%s4121_s2 + $0x6] sm:$0x7] }
 0x142   : > { %v823_v53 = vpop.f32.mrb[37].mxu1  ;;  %v2741_v56 = vpop.f32.mrb[38].mxu0  ;;  %v822_v57 = vadd.f32 %v821_v51, %v3611_v1  ;;  %v901_v2 = vadd.f32 %v900_v54, %v3651_v39  ;;  %v3708_v54 = vrot.slane %v2545_v49, %v3556_v36 }
 0x143   : > { %v825_v55 = vpop.f32.mrb[38].mxu1  ;;  %v912_v61 = vadd.f32 %v2741_v56, %v3651_v39  ;;  %v903_v63 = vpop.f32.mrb[39].mxu0  ;;  %v824_v0 = vadd.f32 %v823_v53, %v3615_v40  ;;  %v3705_v53 = vrot.slane %v2545_v49, %v3554_v35 }
 0x144   : > { %v826_v59 = vadd.f32 %v825_v55, %v3611_v1  ;;  %v827_v62 = vpop.f32.mrb[39].mxu1  ;;  %v904_v4 = vadd.f32 %v903_v63, %v3651_v39  ;;  %v3711_v55 = vrot.slane %v2545_v49, %v3561_v38 }
 0x145   : > { %v828_v3 = vadd.f32 %v827_v62, %v3615_v40  ;;  %v958_v6 = vpack.c.bf16 %v912_v61, %v909_v58 }
 0x146   : > { %v962_v5 = vpack.c.bf16 %v826_v59, %v822_v57  ;;  %v955_v8 = vpack.c.bf16 %v904_v4, %v901_v2 }
 0x147   : > { %v963_v7 = vpack.c.bf16 %v828_v3, %v824_v0  ;;  %983 = vst [vmem:[#allocation2 + $0x118] sm:$0xff] %v958_v6 }
 0x148   : > { %987 = vst [vmem:[#allocation2 + $0x138] sm:$0xff] %v962_v5  ;;  %980 = vst [vmem:[#allocation2 + $0x100] sm:$0xff] %v955_v8  ;;  %v2744_v10 = vpop.f32.mrb[40].mxu0 }
 0x149   : > { %988 = vst [vmem:[#allocation2 + $0x140] sm:$0xff] %v963_v7  ;;  %v831_v9 = vpop.f32.mrb[40].mxu1  ;;  %v916_v12 = vpop.f32.mrb[41].mxu0  ;;  %v925_v16 = vadd.f32 %v2744_v10, %v3651_v39 }
 0x14a   : > { %v833_v11 = vpop.f32.mrb[41].mxu1  ;;  %v2745_v14 = vpop.f32.mrb[42].mxu0  ;;  %v832_v15 = vadd.f32 %v831_v9, %v3611_v1  ;;  %v917_v22 = vadd.f32 %v916_v12, %v3651_v39 }
 0x14b   : > { %v835_v13 = vpop.f32.mrb[42].mxu1  ;;  %v928_v18 = vadd.f32 %v2745_v14, %v3651_v39  ;;  %v919_v20 = vpop.f32.mrb[43].mxu0  ;;  %v834_v21 = vadd.f32 %v833_v11, %v3615_v40 }
 0x14c   : > { %v836_v17 = vadd.f32 %v835_v13, %v3611_v1  ;;  %v837_v19 = vpop.f32.mrb[43].mxu1  ;;  %v920_v24 = vadd.f32 %v919_v20, %v3651_v39 }
 0x14d   : > { %v838_v23 = vadd.f32 %v837_v19, %v3615_v40  ;;  %v964_v26 = vpack.c.bf16 %v928_v18, %v925_v16 }
 0x14e   : > { %v965_v25 = vpack.c.bf16 %v836_v17, %v832_v15  ;;  %v961_v28 = vpack.c.bf16 %v920_v24, %v917_v22 }
 0x14f   : > { %v966_v27 = vpack.c.bf16 %v838_v23, %v834_v21  ;;  %989 = vst [vmem:[#allocation2 + $0x148] sm:$0xff] %v964_v26 }
 0x150   : > { %990 = vst [vmem:[#allocation2 + $0x150] sm:$0xff] %v965_v25  ;;  %986 = vst [vmem:[#allocation2 + $0x130] sm:$0xff] %v961_v28  ;;  %v2748_v60 = vpop.f32.mrb[44].mxu0 }
 0x151   : > { %991 = vst [vmem:[#allocation2 + $0x158] sm:$0xff] %v966_v27  ;;  %v841_v43 = vpop.f32.mrb[44].mxu1  ;;  %v932_v30 = vpop.f32.mrb[45].mxu0  ;;  %v941_v34 = vadd.f32 %v2748_v60, %v3651_v39 }
 0x152   : > { %v843_v29 = vpop.f32.mrb[45].mxu1  ;;  %v2749_v32 = vpop.f32.mrb[46].mxu0  ;;  %v842_v33 = vadd.f32 %v841_v43, %v3611_v1  ;;  %v933_v46 = vadd.f32 %v932_v30, %v3651_v39 }
 0x153   : > { %v845_v31 = vpop.f32.mrb[46].mxu1  ;;  %v944_v41 = vadd.f32 %v2749_v32, %v3651_v39  ;;  %v935_v44 = vpop.f32.mrb[47].mxu0  ;;  %v844_v45 = vadd.f32 %v843_v29, %v3615_v40 }
 0x154   : > { %v846_v37 = vadd.f32 %v845_v31, %v3611_v1  ;;  %v847_v42 = vpop.f32.mrb[47].mxu1  ;;  %v936_v48 = vadd.f32 %v935_v44, %v3651_v39 }
 0x155   : > { %v848_v47 = vadd.f32 %v847_v42, %v3615_v40  ;;  %v970_v51 = vpack.c.bf16 %v944_v41, %v941_v34 }
 0x156   : > { %v968_v50 = vpack.c.bf16 %v846_v37, %v842_v33  ;;  %v967_v1 = vpack.c.bf16 %v936_v48, %v933_v46 }
 0x157   : > { %v969_v52 = vpack.c.bf16 %v848_v47, %v844_v45  ;;  %995 = vst [vmem:[#allocation2 + $0x178] sm:$0xff] %v970_v51 }
 0x158   : > { %993 = vst [vmem:[#allocation2 + $0x168] sm:$0xff] %v968_v50  ;;  %992 = vst [vmem:[#allocation2 + $0x160] sm:$0xff] %v967_v1  ;;  %v1089_v40 = vpop.f32.mrb[48].mxu0 }
 0x159   : > { %994 = vst [vmem:[#allocation2 + $0x170] sm:$0xff] %v969_v52  ;;  %v2756_v39 = vpop.f32.mrb[48].mxu1  ;;  %v1091_v56 = vpop.f32.mrb[49].mxu0  ;;  %v1090_v61 = vadd.f32 %v1089_v40, %v3705_v53 }
 0x15a   : > { %v1202_v57 = vpop.f32.mrb[49].mxu1  ;;  %v1093_v58 = vpop.f32.mrb[50].mxu0  ;;  %v1211_v62 = vadd.f32 %v2756_v39, %v3708_v54  ;;  %v1092_v4 = vadd.f32 %v1091_v56, %v3711_v55 }
 0x15b   : > { %v2757_v59 = vpop.f32.mrb[50].mxu1  ;;  %v1094_v63 = vadd.f32 %v1093_v58, %v3705_v53  ;;  %v1095_v2 = vpop.f32.mrb[51].mxu0  ;;  %v1203_v5 = vadd.f32 %v1202_v57, %v3708_v54 }
 0x15c   : > { %v1214_v0 = vadd.f32 %v2757_v59, %v3708_v54  ;;  %v1205_v3 = vpop.f32.mrb[51].mxu1  ;;  %v1096_v6 = vadd.f32 %v1095_v2, %v3711_v55 }
 0x15d   : > { %v1206_v7 = vadd.f32 %v1205_v3, %v3708_v54  ;;  %v1265_v8 = vpack.c.bf16 %v1094_v63, %v1090_v61 }
 0x15e   : > { %v1270_v9 = vpack.c.bf16 %v1214_v0, %v1211_v62  ;;  %v1266_v10 = vpack.c.bf16 %v1096_v6, %v1092_v4 }
 0x15f   : > { %v1267_v11 = vpack.c.bf16 %v1206_v7, %v1203_v5  ;;  %1290 = vst [vmem:[#allocation2 + $0x180] sm:$0xff] %v1265_v8 }
 0x160   : > { %1295 = vst [vmem:[#allocation2 + $0x1a8] sm:$0xff] %v1270_v9  ;;  %1291 = vst [vmem:[#allocation2 + $0x188] sm:$0xff] %v1266_v10  ;;  %v1099_v12 = vpop.f32.mrb[52].mxu0  ;;  %v3748_v10 = vld [vmem:[%s4121_s2 + $0x9] sm:$0x7] }
 0x161   : > { %1292 = vst [vmem:[#allocation2 + $0x190] sm:$0xff] %v1267_v11  ;;  %v2760_v13 = vpop.f32.mrb[52].mxu1  ;;  %v1101_v14 = vpop.f32.mrb[53].mxu0  ;;  %v1100_v18 = vadd.f32 %v1099_v12, %v3705_v53 }
 0x162   : > { %v1218_v15 = vpop.f32.mrb[53].mxu1  ;;  %v1103_v16 = vpop.f32.mrb[54].mxu0  ;;  %v1227_v19 = vadd.f32 %v2760_v13, %v3708_v54  ;;  %v1102_v24 = vadd.f32 %v1101_v14, %v3711_v55 }
 0x163   : > { %v2761_v17 = vpop.f32.mrb[54].mxu1  ;;  %v1104_v20 = vadd.f32 %v1103_v16, %v3705_v53  ;;  %v1105_v22 = vpop.f32.mrb[55].mxu0  ;;  %v1219_v25 = vadd.f32 %v1218_v15, %v3708_v54  ;;  %v3752_v15 = vrot.slane %v3748_v10, %v3554_v35 }
 0x164   : > { %v1230_v21 = vadd.f32 %v2761_v17, %v3708_v54  ;;  %v1221_v23 = vpop.f32.mrb[55].mxu1  ;;  %v1106_v26 = vadd.f32 %v1105_v22, %v3711_v55 }
 0x165   : > { %v1222_v27 = vadd.f32 %v1221_v23, %v3708_v54  ;;  %v1268_v28 = vpack.c.bf16 %v1104_v20, %v1100_v18 }
 0x166   : > { %v1276_v43 = vpack.c.bf16 %v1230_v21, %v1227_v19  ;;  %v1269_v60 = vpack.c.bf16 %v1106_v26, %v1102_v24 }
 0x167   : > { %v1273_v29 = vpack.c.bf16 %v1222_v27, %v1219_v25  ;;  %1293 = vst [vmem:[#allocation2 + $0x198] sm:$0xff] %v1268_v28 }
 0x168   : > { %1301 = vst [vmem:[#allocation2 + $0x1d8] sm:$0xff] %v1276_v43  ;;  %1294 = vst [vmem:[#allocation2 + $0x1a0] sm:$0xff] %v1269_v60  ;;  %v1109_v30 = vpop.f32.mrb[56].mxu0 }
 0x169   : > { %1298 = vst [vmem:[#allocation2 + $0x1c0] sm:$0xff] %v1273_v29  ;;  %v2764_v31 = vpop.f32.mrb[56].mxu1  ;;  %v1111_v32 = vpop.f32.mrb[57].mxu0  ;;  %v1110_v41 = vadd.f32 %v1109_v30, %v3705_v53 }
 0x16a   : > { %v1234_v33 = vpop.f32.mrb[57].mxu1  ;;  %v1113_v34 = vpop.f32.mrb[58].mxu0  ;;  %v1243_v42 = vadd.f32 %v2764_v31, %v3708_v54  ;;  %v1112_v48 = vadd.f32 %v1111_v32, %v3711_v55 }
 0x16b   : > { %v2765_v37 = vpop.f32.mrb[58].mxu1  ;;  %v1114_v44 = vadd.f32 %v1113_v34, %v3705_v53  ;;  %v1115_v46 = vpop.f32.mrb[59].mxu0  ;;  %v1235_v49 = vadd.f32 %v1234_v33, %v3708_v54 }
 0x16c   : > { %v1246_v45 = vadd.f32 %v2765_v37, %v3708_v54  ;;  %v1237_v47 = vpop.f32.mrb[59].mxu1  ;;  %v1116_v50 = vadd.f32 %v1115_v46, %v3711_v55 }
 0x16d   : > { %v1238_v51 = vadd.f32 %v1237_v47, %v3708_v54  ;;  %v1271_v52 = vpack.c.bf16 %v1114_v44, %v1110_v41 }
 0x16e   : > { %v1282_v1 = vpack.c.bf16 %v1246_v45, %v1243_v42  ;;  %v1272_v40 = vpack.c.bf16 %v1116_v50, %v1112_v48 }
 0x16f   : > { %v1279_v39 = vpack.c.bf16 %v1238_v51, %v1235_v49  ;;  %1296 = vst [vmem:[#allocation2 + $0x1b0] sm:$0xff] %v1271_v52 }
 0x170   : > { %1307 = vst [vmem:[#allocation2 + $0x208] sm:$0xff] %v1282_v1  ;;  %1297 = vst [vmem:[#allocation2 + $0x1b8] sm:$0xff] %v1272_v40  ;;  %v1119_v56 = vpop.f32.mrb[60].mxu0 }
 0x171   : > { %1304 = vst [vmem:[#allocation2 + $0x1f0] sm:$0xff] %v1279_v39  ;;  %v2768_v57 = vpop.f32.mrb[60].mxu1  ;;  %v1121_v58 = vpop.f32.mrb[61].mxu0  ;;  %v1120_v63 = vadd.f32 %v1119_v56, %v3705_v53 }
 0x172   : > { %v1250_v59 = vpop.f32.mrb[61].mxu1  ;;  %v1123_v61 = vpop.f32.mrb[62].mxu0  ;;  %v1259_v0 = vadd.f32 %v2768_v57, %v3708_v54  ;;  %v1122_v6 = vadd.f32 %v1121_v58, %v3711_v55 }
 0x173   : > { %v2769_v62 = vpop.f32.mrb[62].mxu1  ;;  %v1124_v2 = vadd.f32 %v1123_v61, %v3705_v53  ;;  %v1125_v4 = vpop.f32.mrb[63].mxu0  ;;  %v1251_v7 = vadd.f32 %v1250_v59, %v3708_v54 }
 0x174   : > { %v1262_v3 = vadd.f32 %v2769_v62, %v3708_v54  ;;  %v1253_v5 = vpop.f32.mrb[63].mxu1  ;;  %v1126_v8 = vadd.f32 %v1125_v4, %v3711_v55 }
 0x175   : > { %v1254_v9 = vadd.f32 %v1253_v5, %v3708_v54  ;;  %v1274_v11 = vpack.c.bf16 %v1124_v2, %v1120_v63  ;;  %v3756_v54 = vrot.slane %v3748_v10, %v3561_v38 }
 0x176   : > { %v1288_v12 = vpack.c.bf16 %v1262_v3, %v1259_v0  ;;  %v1275_v13 = vpack.c.bf16 %v1126_v8, %v1122_v6 }
 0x177   : > { %v1285_v14 = vpack.c.bf16 %v1254_v9, %v1251_v7  ;;  %1299 = vst [vmem:[#allocation2 + $0x1c8] sm:$0xff] %v1274_v11 }
 0x178   : > { %1313 = vst [vmem:[#allocation2 + $0x238] sm:$0xff] %v1288_v12  ;;  %1300 = vst [vmem:[#allocation2 + $0x1d0] sm:$0xff] %v1275_v13  ;;  %v1129_v16 = vpop.f32.mrb[64].mxu0 }
 0x179   : > { %1310 = vst [vmem:[#allocation2 + $0x220] sm:$0xff] %v1285_v14  ;;  %v1407_v17 = vpop.f32.mrb[64].mxu1  ;;  %v1131_v18 = vpop.f32.mrb[65].mxu0  ;;  %v1130_v22 = vadd.f32 %v1129_v16, %v3705_v53 }
 0x17a   : > { %v1409_v19 = vpop.f32.mrb[65].mxu1  ;;  %v1133_v20 = vpop.f32.mrb[66].mxu0  ;;  %v1408_v23 = vadd.f32 %v1407_v17, %v3752_v15  ;;  %v1132_v27 = vadd.f32 %v1131_v18, %v3711_v55 }
 0x17b   : > { %v1411_v21 = vpop.f32.mrb[66].mxu1  ;;  %v1134_v24 = vadd.f32 %v1133_v20, %v3705_v53  ;;  %v1135_v25 = vpop.f32.mrb[67].mxu0  ;;  %v1410_v28 = vadd.f32 %v1409_v19, %v3756_v54 }
 0x17c   : > { %v1412_v35 = vadd.f32 %v1411_v21, %v3752_v15  ;;  %v1413_v26 = vpop.f32.mrb[67].mxu1  ;;  %v1136_v38 = vadd.f32 %v1135_v25, %v3711_v55 }
 0x17d   : > { %v1414_v43 = vadd.f32 %v1413_v26, %v3756_v54  ;;  %v1277_v60 = vpack.c.bf16 %v1134_v24, %v1130_v22 }
 0x17e   : > { %v1583_v29 = vpack.c.bf16 %v1412_v35, %v1408_v23  ;;  %v1278_v30 = vpack.c.bf16 %v1136_v38, %v1132_v27 }
 0x17f   : > { %v1584_v31 = vpack.c.bf16 %v1414_v43, %v1410_v28  ;;  %1302 = vst [vmem:[#allocation2 + $0x1e0] sm:$0xff] %v1277_v60 }
 0x180   : > { %1608 = vst [vmem:[#allocation2 + $0x240] sm:$0xff] %v1583_v29  ;;  %1303 = vst [vmem:[#allocation2 + $0x1e8] sm:$0xff] %v1278_v30  ;;  %v1139_v32 = vpop.f32.mrb[68].mxu0 }
 0x181   : > { %1609 = vst [vmem:[#allocation2 + $0x248] sm:$0xff] %v1584_v31  ;;  %v1417_v33 = vpop.f32.mrb[68].mxu1  ;;  %v1141_v34 = vpop.f32.mrb[69].mxu0  ;;  %v1140_v44 = vadd.f32 %v1139_v32, %v3705_v53 }
 0x182   : > { %v1419_v37 = vpop.f32.mrb[69].mxu1  ;;  %v1143_v41 = vpop.f32.mrb[70].mxu0  ;;  %v1418_v45 = vadd.f32 %v1417_v33, %v3752_v15  ;;  %v1142_v50 = vadd.f32 %v1141_v34, %v3711_v55 }
 0x183   : > { %v1421_v42 = vpop.f32.mrb[70].mxu1  ;;  %v1144_v46 = vadd.f32 %v1143_v41, %v3705_v53  ;;  %v1145_v48 = vpop.f32.mrb[71].mxu0  ;;  %v1420_v51 = vadd.f32 %v1419_v37, %v3756_v54 }
 0x184   : > { %v1422_v47 = vadd.f32 %v1421_v42, %v3752_v15  ;;  %v1423_v49 = vpop.f32.mrb[71].mxu1  ;;  %v1146_v52 = vadd.f32 %v1145_v48, %v3711_v55 }
 0x185   : > { %v1424_v1 = vadd.f32 %v1423_v49, %v3756_v54  ;;  %v1280_v40 = vpack.c.bf16 %v1144_v46, %v1140_v44 }
 0x186   : > { %v1586_v39 = vpack.c.bf16 %v1422_v47, %v1418_v45  ;;  %v1281_v56 = vpack.c.bf16 %v1146_v52, %v1142_v50 }
 0x187   : > { %v1587_v57 = vpack.c.bf16 %v1424_v1, %v1420_v51  ;;  %1305 = vst [vmem:[#allocation2 + $0x1f8] sm:$0xff] %v1280_v40 }
 0x188   : > { %1611 = vst [vmem:[#allocation2 + $0x258] sm:$0xff] %v1586_v39  ;;  %1306 = vst [vmem:[#allocation2 + $0x200] sm:$0xff] %v1281_v56  ;;  %v1149_v58 = vpop.f32.mrb[72].mxu0 }
 0x189   : > { %1612 = vst [vmem:[#allocation2 + $0x260] sm:$0xff] %v1587_v57  ;;  %v1427_v59 = vpop.f32.mrb[72].mxu1  ;;  %v1151_v61 = vpop.f32.mrb[73].mxu0  ;;  %v1150_v2 = vadd.f32 %v1149_v58, %v3705_v53 }
 0x18a   : > { %v1429_v62 = vpop.f32.mrb[73].mxu1  ;;  %v1153_v63 = vpop.f32.mrb[74].mxu0  ;;  %v1428_v3 = vadd.f32 %v1427_v59, %v3752_v15  ;;  %v1152_v8 = vadd.f32 %v1151_v61, %v3711_v55 }
 0x18b   : > { %v1431_v0 = vpop.f32.mrb[74].mxu1  ;;  %v1154_v4 = vadd.f32 %v1153_v63, %v3705_v53  ;;  %v1155_v6 = vpop.f32.mrb[75].mxu0  ;;  %v1430_v9 = vadd.f32 %v1429_v62, %v3756_v54 }
 0x18c   : > { %v1432_v5 = vadd.f32 %v1431_v0, %v3752_v15  ;;  %v1433_v7 = vpop.f32.mrb[75].mxu1  ;;  %v1156_v11 = vadd.f32 %v1155_v6, %v3711_v55 }
 0x18d   : > { %v1434_v12 = vadd.f32 %v1433_v7, %v3756_v54  ;;  %v1283_v13 = vpack.c.bf16 %v1154_v4, %v1150_v2 }
 0x18e   : > { %v1589_v14 = vpack.c.bf16 %v1432_v5, %v1428_v3  ;;  %v1284_v16 = vpack.c.bf16 %v1156_v11, %v1152_v8 }
 0x18f   : > { %v1590_v17 = vpack.c.bf16 %v1434_v12, %v1430_v9  ;;  %1308 = vst [vmem:[#allocation2 + $0x210] sm:$0xff] %v1283_v13 }
 0x190   : > { %1614 = vst [vmem:[#allocation2 + $0x270] sm:$0xff] %v1589_v14  ;;  %1309 = vst [vmem:[#allocation2 + $0x218] sm:$0xff] %v1284_v16  ;;  %v1159_v18 = vpop.f32.mrb[76].mxu0 }
 0x191   : > { %1615 = vst [vmem:[#allocation2 + $0x278] sm:$0xff] %v1590_v17  ;;  %v1437_v19 = vpop.f32.mrb[76].mxu1  ;;  %v1161_v20 = vpop.f32.mrb[77].mxu0  ;;  %v1160_v24 = vadd.f32 %v1159_v18, %v3705_v53 }
 0x192   : > { %v1439_v21 = vpop.f32.mrb[77].mxu1  ;;  %v1163_v22 = vpop.f32.mrb[78].mxu0  ;;  %v1438_v35 = vadd.f32 %v1437_v19, %v3752_v15  ;;  %v1162_v38 = vadd.f32 %v1161_v20, %v3711_v55 }
 0x193   : > { %v1441_v23 = vpop.f32.mrb[78].mxu1  ;;  %v1164_v25 = vadd.f32 %v1163_v22, %v3705_v53  ;;  %v1165_v27 = vpop.f32.mrb[79].mxu0  ;;  %v1440_v43 = vadd.f32 %v1439_v21, %v3756_v54  ;;  %v3792_v53 = vrot.slane %v3748_v10, %v3556_v36 }
 0x194   : > { %v1442_v26 = vadd.f32 %v1441_v23, %v3752_v15  ;;  %v1443_v28 = vpop.f32.mrb[79].mxu1  ;;  %v1166_v60 = vadd.f32 %v1165_v27, %v3711_v55 }
 0x195   : > { %v1444_v29 = vadd.f32 %v1443_v28, %v3756_v54  ;;  %v1286_v30 = vpack.c.bf16 %v1164_v25, %v1160_v24 }
 0x196   : > { %v1592_v31 = vpack.c.bf16 %v1442_v26, %v1438_v35  ;;  %v1287_v32 = vpack.c.bf16 %v1166_v60, %v1162_v38 }
 0x197   : > { %v1593_v33 = vpack.c.bf16 %v1444_v29, %v1440_v43  ;;  %1311 = vst [vmem:[#allocation2 + $0x228] sm:$0xff] %v1286_v30 }
 0x198   : > { %1617 = vst [vmem:[#allocation2 + $0x288] sm:$0xff] %v1592_v31  ;;  %1312 = vst [vmem:[#allocation2 + $0x230] sm:$0xff] %v1287_v32  ;;  %v2776_v37 = vpop.f32.mrb[80].mxu0 }
 0x199   : > { %1618 = vst [vmem:[#allocation2 + $0x290] sm:$0xff] %v1593_v33  ;;  %v1447_v34 = vpop.f32.mrb[80].mxu1  ;;  %v1520_v42 = vpop.f32.mrb[81].mxu0  ;;  %v1529_v46 = vadd.f32 %v2776_v37, %v3792_v53 }
 0x19a   : > { %v1449_v41 = vpop.f32.mrb[81].mxu1  ;;  %v2777_v55 = vpop.f32.mrb[82].mxu0  ;;  %v1448_v45 = vadd.f32 %v1447_v34, %v3752_v15  ;;  %v1521_v10 = vadd.f32 %v1520_v42, %v3792_v53 }
 0x19b   : > { %v1451_v44 = vpop.f32.mrb[82].mxu1  ;;  %v1532_v48 = vadd.f32 %v2777_v55, %v3792_v53  ;;  %v1523_v50 = vpop.f32.mrb[83].mxu0  ;;  %v1450_v36 = vadd.f32 %v1449_v41, %v3756_v54 }
 0x19c   : > { %v1452_v47 = vadd.f32 %v1451_v44, %v3752_v15  ;;  %v1453_v49 = vpop.f32.mrb[83].mxu1  ;;  %v1524_v52 = vadd.f32 %v1523_v50, %v3792_v53 }
 0x19d   : > { %v1454_v51 = vadd.f32 %v1453_v49, %v3756_v54  ;;  %v1588_v40 = vpack.c.bf16 %v1532_v48, %v1529_v46 }
 0x19e   : > { %v1595_v1 = vpack.c.bf16 %v1452_v47, %v1448_v45  ;;  %v1585_v56 = vpack.c.bf16 %v1524_v52, %v1521_v10 }
 0x19f   : > { %v1596_v39 = vpack.c.bf16 %v1454_v51, %v1450_v36  ;;  %1613 = vst [vmem:[#allocation2 + $0x268] sm:$0xff] %v1588_v40 }
 0x1a0   : > { %1620 = vst [vmem:[#allocation2 + $0x2a0] sm:$0xff] %v1595_v1  ;;  %1610 = vst [vmem:[#allocation2 + $0x250] sm:$0xff] %v1585_v56  ;;  %v2780_v58 = vpop.f32.mrb[84].mxu0 }
 0x1a1   : > { %1621 = vst [vmem:[#allocation2 + $0x2a8] sm:$0xff] %v1596_v39  ;;  %v1457_v57 = vpop.f32.mrb[84].mxu1  ;;  %v1536_v61 = vpop.f32.mrb[85].mxu0  ;;  %v1545_v2 = vadd.f32 %v2780_v58, %v3792_v53 }
 0x1a2   : > { %v1459_v59 = vpop.f32.mrb[85].mxu1  ;;  %v2781_v63 = vpop.f32.mrb[86].mxu0  ;;  %v1458_v0 = vadd.f32 %v1457_v57, %v3752_v15  ;;  %v1537_v8 = vadd.f32 %v1536_v61, %v3792_v53 }
 0x1a3   : > { %v1461_v62 = vpop.f32.mrb[86].mxu1  ;;  %v1548_v4 = vadd.f32 %v2781_v63, %v3792_v53  ;;  %v1539_v6 = vpop.f32.mrb[87].mxu0  ;;  %v1460_v7 = vadd.f32 %v1459_v59, %v3756_v54 }
 0x1a4   : > { %v1462_v3 = vadd.f32 %v1461_v62, %v3752_v15  ;;  %v1463_v5 = vpop.f32.mrb[87].mxu1  ;;  %v1540_v11 = vadd.f32 %v1539_v6, %v3792_v53 }
 0x1a5   : > { %v1464_v9 = vadd.f32 %v1463_v5, %v3756_v54  ;;  %v1594_v13 = vpack.c.bf16 %v1548_v4, %v1545_v2 }
 0x1a6   : > { %v1598_v12 = vpack.c.bf16 %v1462_v3, %v1458_v0  ;;  %v1591_v16 = vpack.c.bf16 %v1540_v11, %v1537_v8 }
 0x1a7   : > { %v1599_v14 = vpack.c.bf16 %v1464_v9, %v1460_v7  ;;  %1619 = vst [vmem:[#allocation2 + $0x298] sm:$0xff] %v1594_v13 }
 0x1a8   : > { %1623 = vst [vmem:[#allocation2 + $0x2b8] sm:$0xff] %v1598_v12  ;;  %1616 = vst [vmem:[#allocation2 + $0x280] sm:$0xff] %v1591_v16  ;;  %v2784_v18 = vpop.f32.mrb[88].mxu0 }
 0x1a9   : > { %1624 = vst [vmem:[#allocation2 + $0x2c0] sm:$0xff] %v1599_v14  ;;  %v1467_v17 = vpop.f32.mrb[88].mxu1  ;;  %v1552_v20 = vpop.f32.mrb[89].mxu0  ;;  %v1561_v24 = vadd.f32 %v2784_v18, %v3792_v53 }
 0x1aa   : > { %v1469_v19 = vpop.f32.mrb[89].mxu1  ;;  %v2785_v22 = vpop.f32.mrb[90].mxu0  ;;  %v1468_v23 = vadd.f32 %v1467_v17, %v3752_v15  ;;  %v1553_v38 = vadd.f32 %v1552_v20, %v3792_v53 }
 0x1ab   : > { %v1471_v21 = vpop.f32.mrb[90].mxu1  ;;  %v1564_v25 = vadd.f32 %v2785_v22, %v3792_v53  ;;  %v1555_v27 = vpop.f32.mrb[91].mxu0  ;;  %v1470_v28 = vadd.f32 %v1469_v19, %v3756_v54 }
 0x1ac   : > { %v1472_v35 = vadd.f32 %v1471_v21, %v3752_v15  ;;  %v1473_v26 = vpop.f32.mrb[91].mxu1  ;;  %v1556_v60 = vadd.f32 %v1555_v27, %v3792_v53 }
 0x1ad   : > { %v1474_v43 = vadd.f32 %v1473_v26, %v3756_v54  ;;  %v1600_v30 = vpack.c.bf16 %v1564_v25, %v1561_v24 }
 0x1ae   : > { %v1601_v29 = vpack.c.bf16 %v1472_v35, %v1468_v23  ;;  %v1597_v32 = vpack.c.bf16 %v1556_v60, %v1553_v38 }
 0x1af   : > { %v1602_v31 = vpack.c.bf16 %v1474_v43, %v1470_v28  ;;  %1625 = vst [vmem:[#allocation2 + $0x2c8] sm:$0xff] %v1600_v30 }
 0x1b0   : > { %1626 = vst [vmem:[#allocation2 + $0x2d0] sm:$0xff] %v1601_v29  ;;  %1622 = vst [vmem:[#allocation2 + $0x2b0] sm:$0xff] %v1597_v32  ;;  %v2788_v34 = vpop.f32.mrb[92].mxu0 }
 0x1b1   : > { %1627 = vst [vmem:[#allocation2 + $0x2d8] sm:$0xff] %v1602_v31  ;;  %v1477_v33 = vpop.f32.mrb[92].mxu1  ;;  %v1568_v41 = vpop.f32.mrb[93].mxu0  ;;  %v1577_v45 = vadd.f32 %v2788_v34, %v3792_v53 }
 0x1b2   : > { %v1479_v37 = vpop.f32.mrb[93].mxu1  ;;  %v2789_v44 = vpop.f32.mrb[94].mxu0  ;;  %v1478_v55 = vadd.f32 %v1477_v33, %v3752_v15  ;;  %v1569_v36 = vadd.f32 %v1568_v41, %v3792_v53 }
 0x1b3   : > { %v1481_v42 = vpop.f32.mrb[94].mxu1  ;;  %v1580_v47 = vadd.f32 %v2789_v44, %v3792_v53  ;;  %v1571_v49 = vpop.f32.mrb[95].mxu0  ;;  %v1480_v50 = vadd.f32 %v1479_v37, %v3756_v54 }
 0x1b4   : > { %v1482_v46 = vadd.f32 %v1481_v42, %v3752_v15  ;;  %v1483_v48 = vpop.f32.mrb[95].mxu1  ;;  %v1572_v51 = vadd.f32 %v1571_v49, %v3792_v53 }
 0x1b5   : > { %v1484_v10 = vadd.f32 %v1483_v48, %v3756_v54  ;;  %v1606_v1 = vpack.c.bf16 %v1580_v47, %v1577_v45 }
 0x1b6   : > { %v1604_v52 = vpack.c.bf16 %v1482_v46, %v1478_v55  ;;  %v1603_v39 = vpack.c.bf16 %v1572_v51, %v1569_v36 }
 0x1b7   : > { %v1605_v40 = vpack.c.bf16 %v1484_v10, %v1480_v50  ;;  %1631 = vst [vmem:[#allocation2 + $0x2f8] sm:$0xff] %v1606_v1 }
 0x1b8   : > { %1629 = vst [vmem:[#allocation2 + $0x2e8] sm:$0xff] %v1604_v52  ;;  %1628 = vst [vmem:[#allocation2 + $0x2e0] sm:$0xff] %v1603_v39 }
 0x1b9   : > { %1630 = vst [vmem:[#allocation2 + $0x2f0] sm:$0xff] %v1605_v40 }
 0x1ba PF: > { %s2620_s7 = smul.u32 192, %s3151_s24  ;;  %v1772_v7 = vlaneseq  ;;  %s2621_s30 = sshll.u32 %s3151_s24, 6  ;;  %vm2260_vm2 = vcmask 261120  }
 0x1bb   : > { %s3961_s18 = scalar_lea.vmem %s4122_s3, %s2621_s30  ;;  %p2610_p0 = scmp.ne.s32.totalorder %s3151_s24, 3 }
 0x1bc   : > { %s3827_s16 = scalar_lea.vmem [#allocation2], %s2620_s7  ;;  %v1773_v8 = vand.u32 127, %v1772_v7 }
 0x1be   : > { %vm1774_vm1 = vcmp.lt.s32.totalorder %v1773_v8, 8 }
 0x1c0   : > { %v1659_v15 = vld [vmem:[%s3827_s16 + $0x8] sm:$0xff]  ;;  %v1660_v54 = vld [vmem:[%s3827_s16 + $0x20] sm:$0xff]  ;;  %v1661_v56 = vld [vmem:[%s3827_s16 + $0x38] sm:$0xff] }
 0x1c1   : > { %2790 = vmatprep.subr.bf16.mxu0 %v1659_v15  ;;  %v1651_v53 = vld [vmem:[%s3827_s16] sm:$0xff]  ;;  %v1662_v57 = vld [vmem:[%s3827_s16 + $0x50] sm:$0xff]  ;;  %v1663_v58 = vld [vmem:[%s3827_s16 + $0x68] sm:$0xff] }
 0x1c2   : > { %2791 = vmatpush3.bf16.xpose.msra.mxu0 %v1659_v15  ;;  %2806 = vmatprep.mubr.bf16.mxu0 %v1651_v53  ;;  %v1664_v59 = vld [vmem:[%s3827_s16 + $0x80] sm:$0xff]  ;;  %v1665_v61 = vld [vmem:[%s3827_s16 + $0x98] sm:$0xff]  ;;  %v1666_v62 = vld [vmem:[%s3827_s16 + $0xb0] sm:$0xff] }
 0x1c3   : > { %2792 = vmatprep.subr.bf16.mxu0 %v1660_v54  ;;  %v1652_v63 = vld [vmem:[%s3827_s16 + $0x18] sm:$0xff]  ;;  %v1653_v0 = vld [vmem:[%s3827_s16 + $0x30] sm:$0xff]  ;;  %v1654_v2 = vld [vmem:[%s3827_s16 + $0x48] sm:$0xff] }
 0x1c4   : > { %v1655_v3 = vld [vmem:[%s3827_s16 + $0x60] sm:$0xff]  ;;  %v1656_v4 = vld [vmem:[%s3827_s16 + $0x78] sm:$0xff]  ;;  %v1657_v5 = vld [vmem:[%s3827_s16 + $0x90] sm:$0xff] }
 0x1c5   : > { %v1658_v6 = vld [vmem:[%s3827_s16 + $0xa8] sm:$0xff]  ;;  %v1667_v55 = vld [vmem:[%s3827_s16 + $0x10] sm:$0xff]  ;;  %v1669_v46 = vld [vmem:[%s3827_s16 + $0x40] sm:$0xff] }
 0x1c6   : > { %v1668_v45 = vld [vmem:[%s3827_s16 + $0x28] sm:$0xff]  ;;  %2822 = vmatprep.subr.bf16.mxu1 %v1667_v55 }
 0x1c7   : > { %2823 = vmatpush3.bf16.msra.mxu1 %v1667_v55  ;;  %v1671_v55 = vld [vmem:[%s3827_s16 + $0x70] sm:$0xff] }
 0x1c8   : > { %2824 = vmatprep.subr.bf16.mxu1 %v1668_v45 }
 0x1ca   : > { %2793 = vmatpush3.bf16.xpose.msra.mxu0 %v1660_v54 }
 0x1cb   : > { %2794 = vmatprep.subr.bf16.mxu0 %v1661_v56  ;;  %2825 = vmatpush3.bf16.msra.mxu1 %v1668_v45 }
 0x1cc   : > { %2826 = vmatprep.subr.bf16.mxu1 %v1669_v46 }
 0x1cf   : > { %2827 = vmatpush3.bf16.msra.mxu1 %v1669_v46  ;;  %v1672_v46 = vld [vmem:[%s3827_s16 + $0x88] sm:$0xff] }
 0x1d2   : > { %2795 = vmatpush3.bf16.xpose.msra.mxu0 %v1661_v56 }
 0x1d3   : > { %2796 = vmatprep.subr.bf16.mxu0 %v1662_v57 }
 0x1da   : > { %2797 = vmatpush3.bf16.xpose.msra.mxu0 %v1662_v57 }
 0x1db   : > { %2798 = vmatprep.subr.bf16.mxu0 %v1663_v58 }
 0x1e2   : > { %2799 = vmatpush3.bf16.xpose.msra.mxu0 %v1663_v58 }
 0x1e3   : > { %2800 = vmatprep.subr.bf16.mxu0 %v1664_v59 }
 0x1ea   : > { %2801 = vmatpush3.bf16.xpose.msra.mxu0 %v1664_v59 }
 0x1eb   : > { %2802 = vmatprep.subr.bf16.mxu0 %v1665_v61 }
 0x1f2   : > { %2803 = vmatpush3.bf16.xpose.msra.mxu0 %v1665_v61 }
 0x1f3   : > { %2804 = vmatprep.subr.bf16.mxu0 %v1666_v62 }
 0x1fa   : > { %2805 = vmatpush3.bf16.xpose.msra.mxu0 %v1666_v62 }
 0x201   : > { %2807 = vmatmul.mubr.bf16.vlgmr.msra.gmra.mrb[0].mxu0 %v1652_v63 }
 0x202   : > { %2810 = vmatprep.mubr.bf16.mxu0 %v1653_v0 }
 0x209   : > { %2811 = vmatmul.mubr.bf16.gmra.mrb[4].mxu0 %v1654_v2 }
 0x20a   : > { %2814 = vmatprep.mubr.bf16.mxu0 %v1655_v3 }
 0x211   : > { %2815 = vmatmul.mubr.bf16.gmra.mrb[8].mxu0 %v1656_v4 }
 0x212   : > { %2818 = vmatprep.mubr.bf16.mxu0 %v1657_v5 }
 0x219   : > { %2819 = vmatmul.mubr.bf16.gmra.mrb[12].mxu0 %v1658_v6 }
 0x2d4   : > { %v2808_v9 = vpop.f32.mrb[0].mxu0 }
 0x2d5   : > { %v1709_v11 = vpop.f32.mrb[1].mxu0  ;;  %v1777_v12 = vsel %vm1774_vm1, %v2808_v9, -1e+30 }
 0x2d6   : > { %1795 = vmax.xlane.f32.xlu1 %v1777_v12  ;;  %v2809_v13 = vpop.f32.mrb[2].mxu0  ;;  %v1775_v14 = vsel %vm1774_vm1, %v1709_v11, -1e+30 }
 0x2d7   : > { %1791 = vmax.xlane.f32.xlu0 %v1775_v14  ;;  %v1712_v16 = vpop.f32.mrb[3].mxu0  ;;  %v1778_v17 = vsel %vm1774_vm1, %v2809_v13, -1e+30 }
 0x2d8   : > { %v1776_v18 = vsel %vm1774_vm1, %v1712_v16, -1e+30 }
 0x2da   : > { %1797 = vmax.xlane.f32.xlu1 %v1778_v17 }
 0x2db   : > { %1793 = vmax.xlane.f32.xlu0 %v1776_v18 }
 0x2dc   : > { %v2812_v19 = vpop.f32.mrb[4].mxu0 }
 0x2dd   : > { %v1725_v20 = vpop.f32.mrb[5].mxu0  ;;  %v3852_v35 = vsel %vm1774_vm1, %v2812_v19, -1e+30 }
 0x2de   : > { %v2813_v21 = vpop.f32.mrb[6].mxu0  ;;  %v1779_v22 = vsel %vm1774_vm1, %v1725_v20, -1e+30 }
 0x2df   : > { %1799 = vmax.xlane.f32.xlu0 %v1779_v22  ;;  %v1728_v23 = vpop.f32.mrb[7].mxu0  ;;  %v3856_v26 = vsel %vm1774_vm1, %v2813_v21, -1e+30 }
 0x2e0   : > { %v1780_v24 = vsel %vm1774_vm1, %v1728_v23, -1e+30 }
 0x2e1   : > { %1801 = vmax.xlane.f32.xlu1 %v1780_v24 }
 0x2e3   : > { %1803 = vmax.xlane.f32.xlu0 %v3852_v35 }
 0x2e4   : > { %v2816_v25 = vpop.f32.mrb[8].mxu0 }
 0x2e5   : > { %1805 = vmax.xlane.f32.xlu1 %v3856_v26  ;;  %v1741_v27 = vpop.f32.mrb[9].mxu0  ;;  %v3868_v29 = vsel %vm1774_vm1, %v2816_v25, -1e+30 }
 0x2e6   : > { %v2817_v28 = vpop.f32.mrb[10].mxu0  ;;  %v3860_v38 = vsel %vm1774_vm1, %v1741_v27, -1e+30 }
 0x2e7   : > { %1807 = vmax.xlane.f32.xlu0 %v3860_v38  ;;  %v1744_v43 = vpop.f32.mrb[11].mxu0  ;;  %v3872_v31 = vsel %vm1774_vm1, %v2817_v28, -1e+30 }
 0x2e8   : > { %v3864_v60 = vsel %vm1774_vm1, %v1744_v43, -1e+30 }
 0x2e9   : > { %1809 = vmax.xlane.f32.xlu1 %v3864_v60 }
 0x2eb   : > { %1811 = vmax.xlane.f32.xlu0 %v3868_v29 }
 0x2ec   : > { %v2820_v30 = vpop.f32.mrb[12].mxu0 }
 0x2ed   : > { %1813 = vmax.xlane.f32.xlu1 %v3872_v31  ;;  %v1757_v32 = vpop.f32.mrb[13].mxu0  ;;  %v3884_v42 = vsel %vm1774_vm1, %v2820_v30, -1e+30 }
 0x2ee   : > { %v2821_v33 = vpop.f32.mrb[14].mxu0  ;;  %v3876_v34 = vsel %vm1774_vm1, %v1757_v32, -1e+30 }
 0x2ef   : > { %1815 = vmax.xlane.f32.xlu0 %v3876_v34  ;;  %v1760_v37 = vpop.f32.mrb[15].mxu0  ;;  %v3888_v44 = vsel %vm1774_vm1, %v2821_v33, -1e+30 }
 0x2f0   : > { %v3880_v41 = vsel %vm1774_vm1, %v1760_v37, -1e+30 }
 0x2f1   : > { %1817 = vmax.xlane.f32.xlu1 %v3880_v41 }
 0x2f3   : > { %1819 = vmax.xlane.f32.xlu0 %v3884_v42 }
 0x2f5   : > { %1821 = vmax.xlane.f32.xlu1 %v3888_v44 }
 0x363   : > { %v1796_v47 = vpop.xlane.xlu1 %1795 }
 0x364   : > { %v1825_v48 = vsub.f32 %v1777_v12, %v1796_v47  ;;  %v1792_v49 = vpop.xlane.xlu0 %1791 }
 0x365   : > { %v1823_v50 = vsub.f32 %v1775_v14, %v1792_v49  ;;  %v1673_v49 = vld [vmem:[%s3827_s16 + $0xa0] sm:$0xff] }
 0x366   : > { %v1843_v51 = vmul.f32 1.442695, %v1825_v48 }
 0x367   : > { %v1839_v36 = vmul.f32 1.442695, %v1823_v50  ;;  %v1798_v10 = vpop.xlane.xlu1 %1797 }
 0x368   : > { %v1826_v52 = vsub.f32 %v1778_v17, %v1798_v10  ;;  %v1794_v1 = vpop.xlane.xlu0 %1793  ;;  %v3001_v10 = vld [vmem:[%s3961_s18] sm:$0xff]  }
 0x369   : > { %3009 = vpow2.f32 %v1839_v36  ;;  %v1824_v40 = vsub.f32 %v1776_v18, %v1794_v1  ;;  %v1674_v36 = vld [vmem:[%s3827_s16 + $0xb8] sm:$0xff] }
 0x36a   : > { %3011 = vpow2.f32 %v1843_v51  ;;  %v1845_v15 = vmul.f32 1.442695, %v1826_v52 }
 0x36b   : > { %v1841_v39 = vmul.f32 1.442695, %v1824_v40 }
 0x36c   : > { %v1800_v54 = vpop.xlane.xlu0 %1799 }
 0x36d   : > { %3013 = vpow2.f32 %v1841_v39  ;;  %v1827_v53 = vsub.f32 %v1779_v22, %v1800_v54 }
 0x36e   : > { %v1802_v56 = vpop.xlane.xlu1 %1801  ;;  %3015 = vpow2.f32 %v1845_v15 }
 0x36f   : > { %v1847_v57 = vmul.f32 1.442695, %v1827_v53  ;;  %v1828_v58 = vsub.f32 %v1780_v24, %v1802_v56 }
 0x370   : > { %v1804_v59 = vpop.xlane.xlu0 %1803 }
 0x371   : > { %3017 = vpow2.f32 %v1847_v57  ;;  %v1849_v61 = vmul.f32 1.442695, %v1828_v58  ;;  %v1829_v62 = vsub.f32 %v3852_v35, %v1804_v59 }
 0x372   : > { %v1806_v63 = vpop.xlane.xlu1 %1805 }
 0x373   : > { %v3895_v0 = vpop.eup %3009  ;;  %v1851_v2 = vmul.f32 1.442695, %v1829_v62  ;;  %v1830_v3 = vsub.f32 %v3856_v26, %v1806_v63  ;;  %3019 = vpow2.f32 %v1849_v61 }
 0x374   : > { %v1808_v4 = vpop.xlane.xlu0 %1807  ;;  %1871 = vadd.xlane.f32.xlu0 %v3895_v0  ;;  %v3900_v7 = vpop.eup %3011 }
 0x375   : > { %3021 = vpow2.f32 %v1851_v2  ;;  %v1853_v5 = vmul.f32 1.442695, %v1830_v3  ;;  %v1831_v6 = vsub.f32 %v3860_v38, %v1808_v4 }
 0x376   : > { %v1810_v8 = vpop.xlane.xlu1 %1809 }
 0x377   : > { %v3902_v9 = vpop.eup %3013  ;;  %v1855_v11 = vmul.f32 1.442695, %v1831_v6  ;;  %v1832_v12 = vsub.f32 %v3864_v60, %v1810_v8  ;;  %3023 = vpow2.f32 %v1853_v5 }
 0x378   : > { %v1812_v13 = vpop.xlane.xlu0 %1811  ;;  %1875 = vadd.xlane.f32.xlu0 %v3900_v7  ;;  %1873 = vadd.xlane.f32.xlu1 %v3902_v9  ;;  %v3908_v17 = vpop.eup %3015 }
 0x379   : > { %3025 = vpow2.f32 %v1855_v11  ;;  %v1857_v14 = vmul.f32 1.442695, %v1832_v12  ;;  %v1833_v16 = vsub.f32 %v3868_v29, %v1812_v13  ;;  %v3002_v11 = vld [vmem:[%s3961_s18 + $0x8] sm:$0xff]  }
 0x37a   : > { %v1814_v18 = vpop.xlane.xlu1 %1813 }
 0x37b   : > { %v3910_v19 = vpop.eup %3017  ;;  %v1859_v20 = vmul.f32 1.442695, %v1833_v16  ;;  %v1834_v21 = vsub.f32 %v3872_v31, %v1814_v18  ;;  %3027 = vpow2.f32 %v1857_v14  ;;  %v1670_v31 = vld [vmem:[%s3827_s16 + $0x58] sm:$0xff] }
 0x37c   : > { %1879 = vadd.xlane.f32.xlu0 %v3910_v19  ;;  %v1816_v22 = vpop.xlane.xlu0 %1815  ;;  %1877 = vadd.xlane.f32.xlu1 %v3908_v17 }
 0x37d   : > { %3029 = vpow2.f32 %v1859_v20  ;;  %v1861_v23 = vmul.f32 1.442695, %v1834_v21  ;;  %v1835_v24 = vsub.f32 %v3876_v34, %v1816_v22  ;;  %v3916_v35 = vpop.eup %3019  ;;  %2828 = vmatprep.subr.bf16.mxu1 %v1670_v31  ;;  %v3003_v20 = vld [vmem:[%s3961_s18 + $0x10] sm:$0xff]  }
 0x37e   : > { %v1818_v25 = vpop.xlane.xlu1 %1817  ;;  %2829 = vmatpush3.bf16.msra.mxu1 %v1670_v31  ;;  %v3005_v31 = vld [vmem:[%s3961_s18 + $0x20] sm:$0xff]  }
 0x37f   : > { %v3918_v26 = vpop.eup %3021  ;;  %v1863_v27 = vmul.f32 1.442695, %v1835_v24  ;;  %v1836_v28 = vsub.f32 %v3880_v41, %v1818_v25  ;;  %3031 = vpow2.f32 %v1861_v23  ;;  %2830 = vmatprep.subr.bf16.mxu1 %v1671_v55 }
 0x380   : > { %1883 = vadd.xlane.f32.xlu0 %v3918_v26  ;;  %v1820_v38 = vpop.xlane.xlu0 %1819  ;;  %1881 = vadd.xlane.f32.xlu1 %v3916_v35 }
 0x381   : > { %3033 = vpow2.f32 %v1863_v27  ;;  %v1865_v43 = vmul.f32 1.442695, %v1836_v28  ;;  %v1837_v60 = vsub.f32 %v3884_v42, %v1820_v38  ;;  %v3924_v29 = vpop.eup %3023  ;;  %v3004_v27 = vld [vmem:[%s3961_s18 + $0x18] sm:$0xff]  }
 0x382   : > { %v1822_v30 = vpop.xlane.xlu1 %1821  ;;  %2831 = vmatpush3.bf16.msra.mxu1 %v1671_v55 }
 0x383   : > { %v3927_v32 = vpop.eup %3025  ;;  %v1867_v33 = vmul.f32 1.442695, %v1837_v60  ;;  %v1838_v34 = vsub.f32 %v3888_v44, %v1822_v30  ;;  %3035 = vpow2.f32 %v1865_v43  ;;  %2832 = vmatprep.subr.bf16.mxu1 %v1672_v46 }
 0x384   : > { %1887 = vadd.xlane.f32.xlu0 %v3927_v32  ;;  %1885 = vadd.xlane.f32.xlu1 %v3924_v29 }
 0x385   : > { %3037 = vpow2.f32 %v1867_v33  ;;  %v1869_v37 = vmul.f32 1.442695, %v1838_v34  ;;  %v3932_v41 = vpop.eup %3027 }
 0x386   : > { %2833 = vmatpush3.bf16.msra.mxu1 %v1672_v46 }
 0x387   : > { %v3934_v42 = vpop.eup %3029  ;;  %3039 = vpow2.f32 %v1869_v37  ;;  %2834 = vmatprep.subr.bf16.mxu1 %v1673_v49 }
 0x388   : > { %1891 = vadd.xlane.f32.xlu0 %v3934_v42  ;;  %1889 = vadd.xlane.f32.xlu1 %v3932_v41 }
 0x389   : > { %v3939_v44 = vpop.eup %3031 }
 0x38a   : > { %2835 = vmatpush3.bf16.msra.mxu1 %v1673_v49 }
 0x38b   : > { %v3941_v45 = vpop.eup %3033  ;;  %2836 = vmatprep.subr.bf16.mxu1 %v1674_v36 }
 0x38c   : > { %1895 = vadd.xlane.f32.xlu0 %v3941_v45  ;;  %1893 = vadd.xlane.f32.xlu1 %v3939_v44 }
 0x38d   : > { %v3946_v47 = vpop.eup %3035 }
 0x38e   : > { %2837 = vmatpush3.bf16.msra.mxu1 %v1674_v36  ;;  %v3007_v36 = vld [vmem:[%s3961_s18 + $0x30] sm:$0xff]  }
 0x38f   : > { %v3948_v48 = vpop.eup %3037  ;;  %2854 = vmatprep.subr.bf16.mxu1 %v3001_v10 }
 0x390   : > { %1899 = vadd.xlane.f32.xlu0 %v3948_v48  ;;  %1897 = vadd.xlane.f32.xlu1 %v3946_v47 }
 0x391   : > { %v3953_v50 = vpop.eup %3039 }
 0x394   : > { %1901 = vadd.xlane.f32.xlu1 %v3953_v50 }
 0x401   : > { %v1872_v51 = vpop.xlane.xlu0 %1871 }
 0x402   : > { %3041 = vrcp.f32 %v1872_v51 }
 0x405   : > { %v1876_v52 = vpop.xlane.xlu0 %1875  ;;  %v1874_v1 = vpop.xlane.xlu1 %1873 }
 0x406   : > { %3043 = vrcp.f32 %v1876_v52 }
 0x407   : > { %3045 = vrcp.f32 %v1874_v1 }
 0x409   : > { %v1880_v40 = vpop.xlane.xlu0 %1879  ;;  %v1878_v39 = vpop.xlane.xlu1 %1877 }
 0x40a   : > { %3047 = vrcp.f32 %v1880_v40 }
 0x40b   : > { %3049 = vrcp.f32 %v1878_v39 }
 0x40c   : > { %v3042_v15 = vpop.eup %3041 }
 0x40d   : > { %v1884_v54 = vpop.xlane.xlu0 %1883  ;;  %v1882_v53 = vpop.xlane.xlu1 %1881  ;;  %v1919_v56 = vmul.f32 %v3042_v15, %v3895_v0 }
 0x40e   : > { %3051 = vrcp.f32 %v1884_v54 }
 0x40f   : > { %3053 = vrcp.f32 %v1882_v53  ;;  %1935 = vst [vmem:[%s3295_s8] sm:$0xff] %v1919_v56 }
 0x410   : > { %v3044_v57 = vpop.eup %3043 }
 0x411   : > { %v3046_v58 = vpop.eup %3045  ;;  %v1888_v59 = vpop.xlane.xlu0 %1887  ;;  %v1921_v62 = vmul.f32 %v3044_v57, %v3900_v7 }
 0x412   : > { %v1886_v61 = vpop.xlane.xlu1 %1885  ;;  %3055 = vrcp.f32 %v1888_v59  ;;  %v1920_v63 = vmul.f32 %v3046_v58, %v3902_v9 }
 0x413   : > { %3057 = vrcp.f32 %v1886_v61  ;;  %1937 = vst [vmem:[%s3295_s8 + $0x10] sm:$0xff] %v1921_v62 }
 0x414   : > { %v3048_v2 = vpop.eup %3047  ;;  %1936 = vst [vmem:[%s3295_s8 + $0x8] sm:$0xff] %v1920_v63  ;;  %v1951_v0 = vpack.c.bf16 %v1920_v63, %v1919_v56 }
 0x415   : > { %v3050_v3 = vpop.eup %3049  ;;  %v1892_v4 = vpop.xlane.xlu0 %1891  ;;  %v1923_v6 = vmul.f32 %v3048_v2, %v3910_v19 }
 0x416   : > { %v1890_v5 = vpop.xlane.xlu1 %1889  ;;  %3059 = vrcp.f32 %v1892_v4  ;;  %2838 = vmatprep.mubr.bf16.mxu1 %v1951_v0  ;;  %v1922_v7 = vmul.f32 %v3050_v3, %v3908_v17 }
 0x417   : > { %3061 = vrcp.f32 %v1890_v5  ;;  %1939 = vst [vmem:[%s3295_s8 + $0x20] sm:$0xff] %v1923_v6 }
 0x418   : > { %v3052_v8 = vpop.eup %3051  ;;  %1938 = vst [vmem:[%s3295_s8 + $0x18] sm:$0xff] %v1922_v7  ;;  %v1952_v9 = vpack.c.bf16 %v1922_v7, %v1921_v62 }
 0x419   : > { %v3054_v12 = vpop.eup %3053  ;;  %v1896_v13 = vpop.xlane.xlu0 %1895  ;;  %v1925_v16 = vmul.f32 %v3052_v8, %v3918_v26 }
 0x41a   : > { %v1894_v14 = vpop.xlane.xlu1 %1893  ;;  %3063 = vrcp.f32 %v1896_v13  ;;  %2839 = vmatmul.mubr.bf16.vlgmr.msra.gmra.mrb[0].mxu1 %v1952_v9  ;;  %v1924_v18 = vmul.f32 %v3054_v12, %v3916_v35  ;;  %v2058_v9 = vld [vmem:[#allocation3 + $0x10] sm:$0xff]  ;;  %v2059_v13 = vld [vmem:[#allocation3 + $0x18] sm:$0xff] }
 0x41b   : > { %3065 = vrcp.f32 %v1894_v14  ;;  %1941 = vst [vmem:[%s3295_s8 + $0x30] sm:$0xff] %v1925_v16  ;;  %2855 = vmatpush3.bf16.msra.mxu1 %v3001_v10 }
 0x41c   : > { %v3056_v17 = vpop.eup %3055  ;;  %1940 = vst [vmem:[%s3295_s8 + $0x28] sm:$0xff] %v1924_v18  ;;  %v1953_v19 = vpack.c.bf16 %v1924_v18, %v1923_v6  ;;  %2856 = vmatprep.subr.bf16.mxu1 %v3002_v11  ;;  %v2057_v18 = vld [vmem:[#allocation3 + $0x8] sm:$0xff] }
 0x41d   : > { %v3058_v21 = vpop.eup %3057  ;;  %v1900_v22 = vpop.xlane.xlu0 %1899  ;;  %v1927_v24 = vmul.f32 %v3056_v17, %v3927_v32 }
 0x41e   : > { %v1898_v23 = vpop.xlane.xlu1 %1897  ;;  %3067 = vrcp.f32 %v1900_v22  ;;  %2842 = vmatprep.mubr.bf16.mxu1 %v1953_v19  ;;  %v1926_v35 = vmul.f32 %v3058_v21, %v3924_v29 }
 0x41f   : > { %3069 = vrcp.f32 %v1898_v23  ;;  %1943 = vst [vmem:[%s3295_s8 + $0x40] sm:$0xff] %v1927_v24  ;;  %2857 = vmatpush3.bf16.msra.mxu1 %v3002_v11  ;;  %v2056_v11 = vld [vmem:[#allocation3] sm:$0xff]  ;;  %v2062_v23 = vld [vmem:[#allocation3 + $0x30] sm:$0xff] }
 0x420   : > { %v3060_v25 = vpop.eup %3059  ;;  %1942 = vst [vmem:[%s3295_s8 + $0x38] sm:$0xff] %v1926_v35  ;;  %v1954_v26 = vpack.c.bf16 %v1926_v35, %v1925_v16  ;;  %2858 = vmatprep.subr.bf16.mxu1 %v3003_v20 }
 0x421   : > { %v3062_v28 = vpop.eup %3061  ;;  %v1929_v43 = vmul.f32 %v3060_v25, %v3934_v42  ;;  %v3006_v42 = vld [vmem:[%s3961_s18 + $0x28] sm:$0xff]   ;;  %v2063_v25 = vld [vmem:[#allocation3 + $0x38] sm:$0xff] }
 0x422   : > { %v1902_v38 = vpop.xlane.xlu1 %1901  ;;  %2843 = vmatmul.mubr.bf16.gmra.mrb[4].mxu1 %v1954_v26  ;;  %v1928_v60 = vmul.f32 %v3062_v28, %v3932_v41  ;;  %v2061_v28 = vld [vmem:[#allocation3 + $0x28] sm:$0xff] }
 0x423   : > { %3071 = vrcp.f32 %v1902_v38  ;;  %1945 = vst [vmem:[%s3295_s8 + $0x50] sm:$0xff] %v1929_v43  ;;  %2859 = vmatpush3.bf16.msra.mxu1 %v3003_v20 }
 0x424   : > { %v3064_v29 = vpop.eup %3063  ;;  %1944 = vst [vmem:[%s3295_s8 + $0x48] sm:$0xff] %v1928_v60  ;;  %v1955_v30 = vpack.c.bf16 %v1928_v60, %v1927_v24  ;;  %2860 = vmatprep.subr.bf16.mxu1 %v3004_v27  ;;  %v2060_v24 = vld [vmem:[#allocation3 + $0x20] sm:$0xff] }
 0x425   : > { %v3066_v32 = vpop.eup %3065  ;;  %v1931_v33 = vmul.f32 %v3064_v29, %v3941_v45 }
 0x426   : > { %2846 = vmatprep.mubr.bf16.mxu1 %v1955_v30  ;;  %v1930_v34 = vmul.f32 %v3066_v32, %v3939_v44  ;;  %v2064_v32 = vld [vmem:[#allocation3 + $0x40] sm:$0xff] }
 0x427   : > { %1947 = vst [vmem:[%s3295_s8 + $0x60] sm:$0xff] %v1931_v33  ;;  %2861 = vmatpush3.bf16.msra.mxu1 %v3004_v27 }
 0x428   : > { %v3068_v37 = vpop.eup %3067  ;;  %1946 = vst [vmem:[%s3295_s8 + $0x58] sm:$0xff] %v1930_v34  ;;  %v1956_v41 = vpack.c.bf16 %v1930_v34, %v1929_v43  ;;  %2862 = vmatprep.subr.bf16.mxu1 %v3005_v31  ;;  %v2067_v34 = vld [vmem:[#allocation3 + $0x58] sm:$0xff] }
 0x429   : > { %v3070_v55 = vpop.eup %3069  ;;  %v1933_v46 = vmul.f32 %v3068_v37, %v3948_v48  ;;  %v3008_v48 = vld [vmem:[%s3961_s18 + $0x38] sm:$0xff]  }
 0x42a   : > { %2847 = vmatmul.mubr.bf16.gmra.mrb[8].mxu1 %v1956_v41  ;;  %v1932_v49 = vmul.f32 %v3070_v55, %v3946_v47 }
 0x42b   : > { %1949 = vst [vmem:[%s3295_s8 + $0x70] sm:$0xff] %v1933_v46  ;;  %2863 = vmatpush3.bf16.msra.mxu1 %v3005_v31  ;;  %v2066_v31 = vld [vmem:[#allocation3 + $0x50] sm:$0xff] }
 0x42c   : > { %1948 = vst [vmem:[%s3295_s8 + $0x68] sm:$0xff] %v1932_v49  ;;  %v1957_v44 = vpack.c.bf16 %v1932_v49, %v1931_v33  ;;  %2864 = vmatprep.subr.bf16.mxu1 %v3006_v42 }
 0x42d   : > { %v3072_v45 = vpop.eup %3071 }
 0x42e   : > { %v1934_v10 = vmul.f32 %v3072_v45, %v3953_v50  ;;  %2850 = vmatprep.mubr.bf16.mxu1 %v1957_v44 }
 0x42f   : > { %2865 = vmatpush3.bf16.msra.mxu1 %v3006_v42  ;;  %v2065_v42 = vld [vmem:[#allocation3 + $0x48] sm:$0xff] }
 0x430   : > { %1950 = vst [vmem:[%s3295_s8 + $0x78] sm:$0xff] %v1934_v10  ;;  %v1958_v51 = vpack.c.bf16 %v1934_v10, %v1933_v46  ;;  %2866 = vmatprep.subr.bf16.mxu1 %v3007_v36  ;;  %v2068_v10 = vld [vmem:[#allocation3 + $0x60] sm:$0xff] }
 0x432   : > { %2851 = vmatmul.mubr.bf16.gmra.mrb[12].mxu1 %v1958_v51 }
 0x433   : > { %2867 = vmatpush3.bf16.msra.mxu1 %v3007_v36  ;;  %v2070_v36 = vld [vmem:[#allocation3 + $0x70] sm:$0xff] }
 0x434   : > { %2868 = vmatprep.subr.bf16.mxu1 %v3008_v48 }
 0x437   : > { %2869 = vmatpush3.bf16.msra.mxu1 %v3008_v48  ;;  %v2071_v48 = vld [vmem:[#allocation3 + $0x78] sm:$0xff] }
 0x4ed   : > { %v2840_v47 = vpop.f32.mrb[0].mxu1 }
 0x4ee   : > { %v1993_v52 = vpop.f32.mrb[1].mxu1 }
 0x4ef   : > { %v2841_v1 = vpop.f32.mrb[2].mxu1 }
 0x4f0   : > { %v2073_v40 = vpack.c.bf16 %v2841_v1, %v2840_v47  ;;  %v1996_v39 = vpop.f32.mrb[3].mxu1  ;;  %v2069_v1 = vld [vmem:[#allocation3 + $0x68] sm:$0xff] }
 0x4f1   : > { %v2072_v15 = vpack.c.bf16 %v1996_v39, %v1993_v52 }
 0x4f3   : > { %2870 = vmatprep.mubr.bf16.mxu1 %v2072_v15 }
 0x4f4   : > { %2871 = vmatmul.mubr.bf16.vlgmr.msra.gmra.mrb[16].mxu1 %v2073_v40 }
 0x4f5   : > { %v2844_v54 = vpop.f32.mrb[4].mxu1 }
 0x4f6   : > { %v2009_v50 = vpop.f32.mrb[5].mxu1 }
 0x4f7   : > { %v2845_v53 = vpop.f32.mrb[6].mxu1 }
 0x4f8   : > { %v2075_v56 = vpack.c.bf16 %v2845_v53, %v2844_v54  ;;  %v2012_v57 = vpop.f32.mrb[7].mxu1 }
 0x4f9   : > { %v2074_v58 = vpack.c.bf16 %v2012_v57, %v2009_v50 }
 0x4fb   : > { %2874 = vmatprep.mubr.bf16.mxu1 %v2074_v58 }
 0x4fc   : > { %2875 = vmatmul.mubr.bf16.gmra.mrb[20].mxu1 %v2075_v56  ;;  %v2611_v56 = vld [vmem:[%s4123_s4] ss:$0 sm:$0xff] (!%p2610_p0) }
 0x4fd   : > { %v2848_v59 = vpop.f32.mrb[8].mxu1 }
 0x4fe   : > { %v2025_v61 = vpop.f32.mrb[9].mxu1 }
 0x4ff   : > { %v2849_v62 = vpop.f32.mrb[10].mxu1 }
 0x500   : > { %v2077_v63 = vpack.c.bf16 %v2849_v62, %v2848_v59  ;;  %v2028_v2 = vpop.f32.mrb[11].mxu1 }
 0x501   : > { %v2076_v0 = vpack.c.bf16 %v2028_v2, %v2025_v61 }
 0x503   : > { %2878 = vmatprep.mubr.bf16.mxu1 %v2076_v0 }
 0x504   : > { %2879 = vmatmul.mubr.bf16.gmra.mrb[24].mxu1 %v2077_v63 }
 0x505   : > { %v2852_v3 = vpop.f32.mrb[12].mxu1 }
 0x506   : > { %v2041_v4 = vpop.f32.mrb[13].mxu1 }
 0x507   : > { %v2853_v5 = vpop.f32.mrb[14].mxu1 }
 0x508   : > { %v2079_v6 = vpack.c.bf16 %v2853_v5, %v2852_v3  ;;  %v2044_v7 = vpop.f32.mrb[15].mxu1 }
 0x509   : > { %v2078_v8 = vpack.c.bf16 %v2044_v7, %v2041_v4 }
 0x50b   : > { %2882 = vmatprep.mubr.bf16.mxu1 %v2078_v8 }
 0x50c   : > { %2883 = vmatmul.mubr.bf16.gmra.mrb[28].mxu1 %v2079_v6 }
 0x5c7   : > { %v2872_v12 = vpop.f32.mrb[16].mxu1 }
 0x5c8   : > { %v2246_v14 = vadd.f32 %v2872_v12, %v2058_v9  ;;  %v2181_v16 = vpop.f32.mrb[17].mxu1 }
 0x5c9   : > { %v2244_v17 = vadd.f32 %v2181_v16, %v2056_v11  ;;  %v2873_v19 = vpop.f32.mrb[18].mxu1 }
 0x5ca   : > { %2263 = vst.msk [vmem:[#allocation3 + $0x10] sm:$0xff] %vm2260_vm2, %v2246_v14  ;;  %v2247_v20 = vadd.f32 %v2873_v19, %v2059_v13  ;;  %v2184_v21 = vpop.f32.mrb[19].mxu1 }
 0x5cb   : > { %2261 = vst.msk [vmem:[#allocation3] sm:$0xff] %vm2260_vm2, %v2244_v17  ;;  %v2245_v22 = vadd.f32 %v2184_v21, %v2057_v18 }
 0x5cc   : > { %2264 = vst.msk [vmem:[#allocation3 + $0x18] sm:$0xff] %vm2260_vm2, %v2247_v20 }
 0x5cd   : > { %2262 = vst.msk [vmem:[#allocation3 + $0x8] sm:$0xff] %vm2260_vm2, %v2245_v22 }
 0x5cf   : > { %v2876_v35 = vpop.f32.mrb[20].mxu1 }
 0x5d0   : > { %v2250_v26 = vadd.f32 %v2876_v35, %v2062_v23  ;;  %v2197_v27 = vpop.f32.mrb[21].mxu1 }
 0x5d1   : > { %v2248_v38 = vadd.f32 %v2197_v27, %v2060_v24  ;;  %v2877_v43 = vpop.f32.mrb[22].mxu1  ;;  %v2283_v61 = vld [vmem:[#allocation3 + $0x10] sm:$0xff] (!%p2610_p0) }
 0x5d2   : > { %2267 = vst.msk [vmem:[#allocation3 + $0x30] sm:$0xff] %vm2260_vm2, %v2250_v26  ;;  %v2251_v60 = vadd.f32 %v2877_v43, %v2063_v25  ;;  %v2200_v29 = vpop.f32.mrb[23].mxu1  ;;  %v2281_v53 = vld [vmem:[#allocation3] sm:$0xff] (!%p2610_p0)  ;;  %v2306_v2 = vadd.f32 (!%p2610_p0), %v2611_v56, %v2283_v61 }
 0x5d3   : > { %2265 = vst.msk [vmem:[#allocation3 + $0x20] sm:$0xff] %vm2260_vm2, %v2248_v38  ;;  %v2249_v30 = vadd.f32 %v2200_v29, %v2061_v28  ;;  %v2304_v58 = vadd.f32 (!%p2610_p0), %v2611_v56, %v2281_v53  ;;  %v2284_v62 = vld [vmem:[#allocation3 + $0x18] sm:$0xff] (!%p2610_p0) }
 0x5d4   : > { %2268 = vst.msk [vmem:[#allocation3 + $0x38] sm:$0xff] %vm2260_vm2, %v2251_v60  ;;  %v2282_v57 = vld [vmem:[#allocation3 + $0x8] sm:$0xff] (!%p2610_p0)  ;;  %v2307_v0 = vadd.f32 (!%p2610_p0), %v2611_v56, %v2284_v62  ;;  %2322 = vst.msk [vmem:[%s3293_s14 + $0x10] sm:$0xff] (!%p2610_p0), %vm2260_vm2, %v2306_v2 }
 0x5d5   : > { %2266 = vst.msk [vmem:[#allocation3 + $0x28] sm:$0xff] %vm2260_vm2, %v2249_v30  ;;  %v2305_v59 = vadd.f32 (!%p2610_p0), %v2611_v56, %v2282_v57  ;;  %2320 = vst.msk [vmem:[%s3293_s14] sm:$0xff] (!%p2610_p0), %vm2260_vm2, %v2304_v58 }
 0x5d6   : > { %2323 = vst.msk [vmem:[%s3293_s14 + $0x18] sm:$0xff] (!%p2610_p0), %vm2260_vm2, %v2307_v0 }
 0x5d7   : > { %v2880_v33 = vpop.f32.mrb[24].mxu1  ;;  %2321 = vst.msk [vmem:[%s3293_s14 + $0x8] sm:$0xff] (!%p2610_p0), %vm2260_vm2, %v2305_v59 }
 0x5d8   : > { %v2254_v37 = vadd.f32 %v2880_v33, %v2066_v31  ;;  %v2213_v41 = vpop.f32.mrb[25].mxu1 }
 0x5d9   : > { %v2252_v55 = vadd.f32 %v2213_v41, %v2064_v32  ;;  %v2881_v46 = vpop.f32.mrb[26].mxu1  ;;  %v2287_v5 = vld [vmem:[#allocation3 + $0x30] sm:$0xff] (!%p2610_p0) }
 0x5da   : > { %2271 = vst.msk [vmem:[#allocation3 + $0x50] sm:$0xff] %vm2260_vm2, %v2254_v37  ;;  %v2255_v49 = vadd.f32 %v2881_v46, %v2067_v34  ;;  %v2216_v45 = vpop.f32.mrb[27].mxu1  ;;  %v2285_v63 = vld [vmem:[#allocation3 + $0x20] sm:$0xff] (!%p2610_p0)  ;;  %v2310_v8 = vadd.f32 (!%p2610_p0), %v2611_v56, %v2287_v5 }
 0x5db   : > { %2269 = vst.msk [vmem:[#allocation3 + $0x40] sm:$0xff] %vm2260_vm2, %v2252_v55  ;;  %v2253_v44 = vadd.f32 %v2216_v45, %v2065_v42  ;;  %v2308_v3 = vadd.f32 (!%p2610_p0), %v2611_v56, %v2285_v63  ;;  %v2288_v6 = vld [vmem:[#allocation3 + $0x38] sm:$0xff] (!%p2610_p0) }
 0x5dc   : > { %2272 = vst.msk [vmem:[#allocation3 + $0x58] sm:$0xff] %vm2260_vm2, %v2255_v49  ;;  %v2286_v4 = vld [vmem:[#allocation3 + $0x28] sm:$0xff] (!%p2610_p0)  ;;  %v2311_v9 = vadd.f32 (!%p2610_p0), %v2611_v56, %v2288_v6  ;;  %2326 = vst.msk [vmem:[%s3293_s14 + $0x30] sm:$0xff] (!%p2610_p0), %vm2260_vm2, %v2310_v8 }
 0x5dd   : > { %2270 = vst.msk [vmem:[#allocation3 + $0x48] sm:$0xff] %vm2260_vm2, %v2253_v44  ;;  %v2309_v7 = vadd.f32 (!%p2610_p0), %v2611_v56, %v2286_v4  ;;  %2324 = vst.msk [vmem:[%s3293_s14 + $0x20] sm:$0xff] (!%p2610_p0), %vm2260_vm2, %v2308_v3 }
 0x5de   : > { %2327 = vst.msk [vmem:[%s3293_s14 + $0x38] sm:$0xff] (!%p2610_p0), %vm2260_vm2, %v2311_v9 }
 0x5df   : > { %v2884_v51 = vpop.f32.mrb[28].mxu1  ;;  %2280 = sbr.rel (%p2610_p0) target bundleno = 1520 (0x5f0), region = 48  ;;  %2325 = vst.msk [vmem:[%s3293_s14 + $0x28] sm:$0xff] (!%p2610_p0), %vm2260_vm2, %v2309_v7 }
 0x5e0   : > { %v2258_v47 = vadd.f32 %v2884_v51, %v2070_v36  ;;  %v2229_v52 = vpop.f32.mrb[29].mxu1 }
 0x5e1   : > { %v2256_v40 = vadd.f32 %v2229_v52, %v2068_v10  ;;  %v2885_v39 = vpop.f32.mrb[30].mxu1  ;;  %v2291_v13 = vld [vmem:[#allocation3 + $0x50] sm:$0xff] (!%p2610_p0) }
 0x5e2   : > { %2275 = vst.msk [vmem:[#allocation3 + $0x70] sm:$0xff] %vm2260_vm2, %v2258_v47  ;;  %v2259_v15 = vadd.f32 %v2885_v39, %v2071_v48  ;;  %v2232_v54 = vpop.f32.mrb[31].mxu1  ;;  %v2289_v11 = vld [vmem:[#allocation3 + $0x40] sm:$0xff] (!%p2610_p0)  ;;  %v2314_v18 = vadd.f32 (!%p2610_p0), %v2611_v56, %v2291_v13 }
 0x5e3   : > { %2273 = vst.msk [vmem:[#allocation3 + $0x60] sm:$0xff] %vm2260_vm2, %v2256_v40  ;;  %v2257_v50 = vadd.f32 %v2232_v54, %v2069_v1  ;;  %v2312_v14 = vadd.f32 (!%p2610_p0), %v2611_v56, %v2289_v11  ;;  %v2292_v17 = vld [vmem:[#allocation3 + $0x58] sm:$0xff] (!%p2610_p0) }
 0x5e4   : > { %2276 = vst.msk [vmem:[#allocation3 + $0x78] sm:$0xff] %vm2260_vm2, %v2259_v15  ;;  %v2290_v12 = vld [vmem:[#allocation3 + $0x48] sm:$0xff] (!%p2610_p0)  ;;  %v2315_v21 = vadd.f32 (!%p2610_p0), %v2611_v56, %v2292_v17  ;;  %2330 = vst.msk [vmem:[%s3293_s14 + $0x50] sm:$0xff] (!%p2610_p0), %vm2260_vm2, %v2314_v18 }
 0x5e5   : > { %2274 = vst.msk [vmem:[#allocation3 + $0x68] sm:$0xff] %vm2260_vm2, %v2257_v50  ;;  %v2313_v16 = vadd.f32 (!%p2610_p0), %v2611_v56, %v2290_v12  ;;  %2328 = vst.msk [vmem:[%s3293_s14 + $0x40] sm:$0xff] (!%p2610_p0), %vm2260_vm2, %v2312_v14 }
 0x5e6   : > { %2331 = vst.msk [vmem:[%s3293_s14 + $0x58] sm:$0xff] %vm2260_vm2, %v2315_v21 }
 0x5e7   : > { %2329 = vst.msk [vmem:[%s3293_s14 + $0x48] sm:$0xff] %vm2260_vm2, %v2313_v16 }
 0x5e9   : > { %v2295_v24 = vld [vmem:[#allocation3 + $0x70] sm:$0xff] }
 0x5ea   : > { %v2293_v19 = vld [vmem:[#allocation3 + $0x60] sm:$0xff]  ;;  %v2318_v25 = vadd.f32 %v2611_v56, %v2295_v24 }
 0x5eb   : > { %v2316_v22 = vadd.f32 %v2611_v56, %v2293_v19  ;;  %v2296_v35 = vld [vmem:[#allocation3 + $0x78] sm:$0xff] }
 0x5ec   : > { %v2294_v20 = vld [vmem:[#allocation3 + $0x68] sm:$0xff]  ;;  %v2319_v26 = vadd.f32 %v2611_v56, %v2296_v35  ;;  %2334 = vst.msk [vmem:[%s3293_s14 + $0x70] sm:$0xff] %vm2260_vm2, %v2318_v25 }
 0x5ed   : > { %v2317_v23 = vadd.f32 %v2611_v56, %v2294_v20  ;;  %2332 = vst.msk [vmem:[%s3293_s14 + $0x60] sm:$0xff] %vm2260_vm2, %v2316_v22 }
 0x5ee   : > { %2335 = vst.msk [vmem:[%s3293_s14 + $0x78] sm:$0xff] %vm2260_vm2, %v2319_v26 }
 0x5ef   : > { %2333 = vst.msk [vmem:[%s3293_s14 + $0x68] sm:$0xff] %vm2260_vm2, %v2317_v23 }
 0x5f0 PF: > { %s2613_s20 = sshll.u32 %s3151_s24, 4  ;;  %s2614_s29 = sshll.u32 %s3155_s25, 6 }
 0x5f1   : > { %s2360_s9 = sshll.u32 %s3295_s8, 4  ;;  %s2357_s27 = sadd.s32 %s2614_s29, %s2613_s20  ;;  %s4058_s9 = int_to_ptr.vmem [resolvable:$true] %s2360_s9 }
 0x5f2   : > { %s2615_s7 = sshll.u32 %s2357_s27, 7  ;;  %s4135_s12 = sand.u32 1, %s3143_s22  }
 0x5f3   : > { %s4063_s14 = scalar_lea.hbm %s4125_s6, %s2615_s7  ;;  %s4067_s13 = scalar_lea.sflag [#allocation5], %s4135_s12 }
 0x5f4   : > { %s3073_s18 = scalar_lea.vmem %s4058_s9, 2048  ;;  %s3171_s24 = smov [#allocation4]  }
 0x5f5   : > { %p3074_p1 = scmp.ne.s32.totalorder %s4058_s9, %s3073_s18  ;;  %s3077_s25 = sshll.u32 %s3171_s24, 4  ;;  %s3078_s25 = int_to_ptr.vmem [resolvable:$false] %s3077_s25 }
 0x5f6   : > { %s3079_s8 = scalar_lea.vmem %s3078_s25, 4096  ;;  %p3080_p5 = scmp.lt.s32.totalorder %s4058_s9, %s3078_s25 }
 0x5f7   : > { %p3075_p2 = pnand %p3074_p1, %p3260_p3  ;;  %p3081_p6 = scmp.lt.s32.totalorder %s3079_s8, %s3073_s18 }
 0x5f9   : > { %p3076_p4 = pneg %p3075_p2  ;;  %p3082_p7 = por %p3081_p6, %p3080_p5 }
 0x5fb   : > { %p3083_p9 = pnand %p3082_p7, %p3076_p4 }
 0x5fd   : > { %3086 = shalt.err (!%p3083_p9)
}
 0x5fe   : > { %s3087_s19 = scalar_lea.hbm %s4063_s14, 2048  ;;  %s3091_s29 = scalar_lea.hbm %s4125_s6, 16384 }
 0x5ff   : > { %p3088_p10 = scmp.ne.s32.totalorder %s4063_s14, %s3087_s19  ;;  %p3092_p13 = scmp.lt.u32.totalorder %s4063_s14, %s4125_s6 }
 0x600   : > { %p3093_p0 = scmp.lt.u32.totalorder %s3091_s29, %s3087_s19  ;;  %p3095_p2 = scmp.lt.u32.totalorder %s3087_s19, %s4063_s14 }
 0x601   : > { %p3089_p11 = pnand %p3088_p10, %p3260_p3 }
 0x602   : > { %p3094_p1 = por %p3093_p0, %p3092_p13 }
 0x603   : > { %p3090_p12 = pneg %p3089_p11 }
 0x604   : > { %p3096_p4 = por %p3095_p2, %p3094_p1 }
 0x606   : > { %p3097_p5 = pnand %p3096_p4, %p3090_p12 }
 0x608   : > { %3100 = shalt.err (!%p3097_p5)
}
 0x609   : > { %s3172_s16 = smov 128   ;;  %s3173_s30 = smov 8  }
 0x60a   : > { %2886 = dma.vmem_to_hbm [thread:$0]  (%p3260_p3), %s4058_s9, 2048, %s4063_s14, %s4067_s13, %s3172_s16, %s3172_s16, %s3173_s30  }
 0x60b PF: > { %p2892_p6 = scmp.ge.s32.totalorder %s3167_s28, 2  ;;  %s2383_s12 = sand.u32 1, %s3139_s21  }
 0x60c   : > { %s2384_s18 = scalar_lea.sflag [#allocation5], %s2383_s12 }
 0x60d   : > { %p2889_p7 = pnand %p2892_p6, %p3269_p8 }
 0x60f   : > { %3134 = dma.done.wait (!%p2889_p7), %s2384_s18, 2048  }
 0x610   : > { %3136 = vsyncadd (!%p2889_p7), %s2384_s18, 4294965248  ;;  %s20_s28 = sadd.s32 1, %s3167_s28   ;;  %s4136_s25 = sld [smem:[#allocation7_spill]] }
 0x611   : > { %p17_p9 = scmp.ge.s32.totalorder %s20_s28, 10   ;;  %s4137_s10 = sld [smem:[#allocation8_spill]] }
 0x612   : > { %s4138_s27 = sld [smem:[#allocation9_spill]]  ;;  %s4139_s21 = smov %s3143_s22 }
 0x613   : > { %s4140_s22 = smov %s3147_s23  ;;  %s4141_s23 = smov %s3278_s15 }
 0x614   : > { %s4142_s24 = smov %s3159_s26  ;;  %19 = sbr.rel (!%p17_p9) target bundleno = 5 (0x5), region = 106 }
 0x617   : > { %s4143_s26 = smov %s4137_s10 }
 0x61b   :  { %2389 = vsyncpa [#allocation5], 1 }
 0x61c   :  { %2391 = vsyncpa [#allocation5 + $0x1], 1 }

</bundles_post_ra>
